<compile_context>
chip_gen: v5e
topology: v5e:2x2
jax: 0.10.0
libtpu: 0.0.40
codegen_flags: <defaults>
</compile_context>

<pallas_src>
import functools
import math

import jax
import jax.numpy as jnp
import numpy as np
from jax.experimental import pallas as pl
from jax.experimental.pallas import tpu as pltpu


# ----------------------------- slab layout ---------------------------------

def _slab_layout(d_model, d_ff):
    """Static column offsets of the packed weight slab and bias/LN slab."""
    D, F = d_model, d_ff
    w_cols, off = {}, 0
    for name, n in (("sqkv", 3 * D), ("so", D), ("cq", D), ("ckv", 2 * D),
                    ("co", D), ("f1", F)):
        w_cols[name] = (off, n)
        off += n
    w_total = off
    b_cols, off = {}, 0
    for name, n in (("sqkv", 3 * D), ("so", D), ("cq", D), ("ckv", 2 * D),
                    ("co", D), ("f1", F), ("f2", D),
                    ("g1", D), ("be1", D), ("g2", D), ("be2", D),
                    ("g3", D), ("be3", D)):
        b_cols[name] = (off, n)
        off += n
    b_total = off
    return w_cols, w_total, b_cols, b_total


# ----------------------------- kernel helpers -------------------------------

def _layernorm(x, g, b, eps=1e-5):
    mu = jnp.mean(x, axis=-1, keepdims=True)
    xc = x - mu
    var = jnp.mean(xc * xc, axis=-1, keepdims=True)
    return xc * jax.lax.rsqrt(var + eps) * g + b


def _mha(q, k, v, *, n_heads, n_batch, len_q, len_kv):
    """Per-batch multi-head attention on batch-folded activations.

    q: (n_batch*len_q, D), k/v: (n_batch*len_kv, D) -> (n_batch*len_q, D).
    (batch, head) pairs are stacked on a leading axis so scores / softmax / PV
    are one batched einsum each rather than a per-head loop of tiny dots.
    """
    d = q.shape[-1]
    dh = d // n_heads
    scale = 1.0 / math.sqrt(dh)

    def split(t, lt):
        return jnp.stack(
            [t[b * lt:(b + 1) * lt, h * dh:(h + 1) * dh]
             for b in range(n_batch) for h in range(n_heads)], axis=0)

    qh = split(q, len_q)                                   # (B*H, Lq, dh)
    kh = split(k, len_kv)                                  # (B*H, Lk, dh)
    vh = split(v, len_kv)                                  # (B*H, Lk, dh)

    s = jnp.einsum("gqd,gkd->gqk", qh, kh,
                   preferred_element_type=jnp.float32) * scale
    s = s - jnp.max(s, axis=-1, keepdims=True)
    e = jnp.exp(s)
    p = e * pl.reciprocal(jnp.sum(e, axis=-1, keepdims=True), approx=True)
    o = jnp.einsum("gqk,gkd->gqd", p, vh,
                   preferred_element_type=jnp.float32)     # (B*H, Lq, dh)

    rows = [jnp.concatenate([o[b * n_heads + h] for h in range(n_heads)], axis=-1)
            for b in range(n_batch)]                       # each (Lq, D)
    return jnp.concatenate(rows, axis=0)                   # (B*Lq, D)


# ------------------------------- the kernel ---------------------------------

def decoder_layer_kernel(x_ref, c_ref, wd_ref, wf2_ref, b_ref, o_ref, *,
                         n_heads, n_batch, len_q, len_kv, d_model, d_ff):
    D, F = d_model, d_ff
    w_cols, _, b_cols, _ = _slab_layout(D, F)

    def w(name):                       # static column slice of the weight slab
        a, n = w_cols[name]
        return wd_ref[:, a:a + n]

    def bvec(name):                    # (1, n) row -> broadcasts over tokens
        a, n = b_cols[name]
        return b_ref[:, a:a + n]

    x = x_ref[...]                     # (B*L, D), batch-folded
    c = c_ref[...]                     # (B*S, D), batch-folded

    mha = functools.partial(_mha, n_heads=n_heads, n_batch=n_batch, len_q=len_q)

    # ---- self attention: fused QKV projection -> batched MHA -> out proj ----
    qkv = jnp.dot(x, w("sqkv"), preferred_element_type=jnp.float32) + bvec("sqkv")
    sa = mha(qkv[:, :D], qkv[:, D:2 * D], qkv[:, 2 * D:], len_kv=len_q)
    sa = jnp.dot(sa, w("so"), preferred_element_type=jnp.float32) + bvec("so")
    x = _layernorm(x + sa, bvec("g1"), bvec("be1"))        # norm1

    # ---- cross attention: Q from x, fused K/V projection from cross ----
    q = jnp.dot(x, w("cq"), preferred_element_type=jnp.float32) + bvec("cq")
    kv = jnp.dot(c, w("ckv"), preferred_element_type=jnp.float32) + bvec("ckv")
    ca = mha(q, kv[:, :D], kv[:, D:], len_kv=len_kv)
    ca = jnp.dot(ca, w("co"), preferred_element_type=jnp.float32) + bvec("co")
    x = _layernorm(x + ca, bvec("g2"), bvec("be2"))        # norm2

    # ---- FFN: Conv1d(kernel_size=1) == pointwise linear; relu activation ----
    y = jnp.dot(x, w("f1"), preferred_element_type=jnp.float32) + bvec("f1")
    y = jnp.maximum(y, 0.0)
    y = jnp.dot(y, wf2_ref[...], preferred_element_type=jnp.float32) + bvec("f2")
    out = _layernorm(x + y, bvec("g3"), bvec("be3"))       # norm3, (B*L, D)

    # ---- lane-dense store: (B, L*D) slab (L*D is a multiple of 128) ----
    rows = []
    for b in range(n_batch):
        rows.append(jnp.concatenate(
            [out[b * len_q + l:b * len_q + l + 1, :] for l in range(len_q)],
            axis=-1))                                      # (1, L*D)
    o_ref[...] = jnp.concatenate(rows, axis=0).astype(o_ref.dtype)


# ------------------------------- wrapper -------------------------------------

def pack_params(params):
    """Pack 18 tensors into: (D, *) weight slab, ffn2 weight, bias/LN slab."""
    w_d = jnp.concatenate([params["w_self_qkv"], params["w_self_out"],
                           params["w_cross_q"], params["w_cross_kv"],
                           params["w_cross_out"], params["w_ffn1"]], axis=1)
    b_all = jnp.concatenate([params["b_self_qkv"], params["b_self_out"],
                             params["b_cross_q"], params["b_cross_kv"],
                             params["b_cross_out"], params["b_ffn1"],
                             params["b_ffn2"],
                             params["ln_gamma"][0], params["ln_beta"][0],
                             params["ln_gamma"][1], params["ln_beta"][1],
                             params["ln_gamma"][2], params["ln_beta"][2]], axis=1)
    return w_d, params["w_ffn2"], b_all


def decoder_layer_forward(x, cross, params, n_heads):
    B, L, D = x.shape
    S = cross.shape[1]
    F = params["w_ffn1"].shape[1]
    assert D % n_heads == 0, "d_model must be divisible by n_heads"

    _, w_total, _, b_total = _slab_layout(D, F)
    w_d, w_f2, b_all = pack_params(params)
    assert w_d.shape == (D, w_total) and b_all.shape == (1, b_total)

    # Batch-folded 2-D activations (leading-dim collapse is layout-preserving).
    x2 = x.reshape(B * L, D).astype(jnp.float32)
    c2 = cross.reshape(B * S, D).astype(jnp.float32)

    kernel = functools.partial(
        decoder_layer_kernel, n_heads=n_heads, n_batch=B,
        len_q=L, len_kv=S, d_model=D, d_ff=F)

    z = lambda i: (0, 0)
    grid_spec = pltpu.PrefetchScalarGridSpec(
        num_scalar_prefetch=0,
        grid=(1,),                              # batch folded: one grid step
        in_specs=[
            pl.BlockSpec((B * L, D), z),        # x (folded)
            pl.BlockSpec((B * S, D), z),        # cross (folded)
            pl.BlockSpec((D, w_total), z),      # packed (D, *) weight slab
            pl.BlockSpec((F, D), z),            # ffn2 weight
            pl.BlockSpec((1, b_total), z),      # packed bias / LayerNorm slab
        ],
        out_specs=pl.BlockSpec((B, L * D), z),  # lane-dense output slab
    )

    out_flat = pl.pallas_call(
        kernel,
        out_shape=jax.ShapeDtypeStruct((B, L * D), jnp.float32),
        grid_spec=grid_spec,
        compiler_params=pltpu.CompilerParams(
            dimension_semantics=("arbitrary",)),
    )(x2, c2, w_d, w_f2, b_all)

    return out_flat.reshape(B, L, D)


# ------------------------------ params / reference --------------------------

def init_params(key, d_model, d_ff):
    ks = jax.random.split(key, 16)

    def u(k, fan_in, shape):
        bound = 1.0 / math.sqrt(fan_in)
        return jax.random.uniform(k, shape, jnp.float32, -bound, bound)

    return {
        "w_self_qkv":  u(ks[0],  d_model, (d_model, 3 * d_model)),
        "b_self_qkv":  u(ks[1],  d_model, (1, 3 * d_model)),
        "w_self_out":  u(ks[2],  d_model, (d_model, d_model)),
        "b_self_out":  u(ks[3],  d_model, (1, d_model)),
        "w_cross_q":   u(ks[4],  d_model, (d_model, d_model)),
        "b_cross_q":   u(ks[5],  d_model, (1, d_model)),
        "w_cross_kv":  u(ks[6],  d_model, (d_model, 2 * d_model)),
        "b_cross_kv":  u(ks[7],  d_model, (1, 2 * d_model)),
        "w_cross_out": u(ks[8],  d_model, (d_model, d_model)),
        "b_cross_out": u(ks[9],  d_model, (1, d_model)),
        "ln_gamma":    jnp.ones((3, 1, d_model), jnp.float32),
        "ln_beta":     jnp.zeros((3, 1, d_model), jnp.float32),
        "w_ffn1":      u(ks[10], d_model, (d_model, d_ff)),
        "b_ffn1":      u(ks[11], d_model, (1, d_ff)),
        "w_ffn2":      u(ks[12], d_ff,    (d_ff, d_model)),
        "b_ffn2":      u(ks[13], d_ff,    (1, d_model)),
    }


def reference_forward(x, cross, params, n_heads, eps=1e-5):
    """Pure-JAX reference mirroring the PyTorch DecoderLayer forward (eval mode)."""
    def ln(z, g, b):
        mu = z.mean(-1, keepdims=True)
        var = ((z - mu) ** 2).mean(-1, keepdims=True)
        return (z - mu) / jnp.sqrt(var + eps) * g + b

    def mha(q, k, v):
        B, Lq, D = q.shape
        Lk = k.shape[1]
        dh = D // n_heads
        qh = q.reshape(B, Lq, n_heads, dh)
        kh = k.reshape(B, Lk, n_heads, dh)
        vh = v.reshape(B, Lk, n_heads, dh)
        s = jnp.einsum("bqhd,bkhd->bhqk", qh, kh) / math.sqrt(dh)
        p = jax.nn.softmax(s, axis=-1)
        o = jnp.einsum("bhqk,bkhd->bqhd", p, vh)
        return o.reshape(B, Lq, D)

    D = x.shape[-1]
    g = params["ln_gamma"][:, 0]
    be = params["ln_beta"][:, 0]

    qkv = x @ params["w_self_qkv"] + params["b_self_qkv"][0]
    sa = mha(qkv[..., :D], qkv[..., D:2 * D], qkv[..., 2 * D:])
    sa = sa @ params["w_self_out"] + params["b_self_out"][0]
    x1 = ln(x + sa, g[0], be[0])

    q = x1 @ params["w_cross_q"] + params["b_cross_q"][0]
    kv = cross @ params["w_cross_kv"] + params["b_cross_kv"][0]
    ca = mha(q, kv[..., :D], kv[..., D:])
    ca = ca @ params["w_cross_out"] + params["b_cross_out"][0]
    x2 = ln(x1 + ca, g[1], be[1])

    y = jnp.maximum(x2 @ params["w_ffn1"] + params["b_ffn1"][0], 0.0)
    y = y @ params["w_ffn2"] + params["b_ffn2"][0]
    return ln(x2 + y, g[2], be[2])


if __name__ == "__main__":
    # Small shapes consistent with the module: batch=2, seq=8, d_model=32,
    # d_ff = 4*d_model = 128, 4 attention heads.
    B, L, S, d_model, n_heads = 2, 8, 8, 32, 4
    d_ff = 4 * d_model

    key = jax.random.PRNGKey(0)
    kx, kc, kp = jax.random.split(key, 3)
    x = jax.random.normal(kx, (B, L, d_model), dtype=jnp.float32)
    cross = jax.random.normal(kc, (B, S, d_model), dtype=jnp.float32)
    params = init_params(kp, d_model, d_ff)

    out = decoder_layer_forward(x, cross, params, n_heads)
    out = jax.block_until_ready(out)

    ref = reference_forward(x, cross, params, n_heads)
    np.testing.assert_allclose(np.asarray(out), np.asarray(ref), rtol=2e-2, atol=2e-2)

    print("KERNEL_OK")
</pallas_src>

<mosaic_0001>
module attributes {stable_mosaic.version = 11 : i64} {
  func.func @decoder_layer_kernel(%arg0: i32, %arg1: memref<16x32xf32, #tpu.memory_space<vmem>>, %arg2: memref<16x32xf32, #tpu.memory_space<vmem>>, %arg3: memref<32x384xf32, #tpu.memory_space<vmem>>, %arg4: memref<128x32xf32, #tpu.memory_space<vmem>>, %arg5: memref<1x608xf32, #tpu.memory_space<vmem>>, %arg6: memref<2x256xf32, #tpu.memory_space<vmem>>) attributes {dimension_semantics = [#tpu.dimension_semantics<arbitrary>], iteration_bounds = array<i64: 1>, scalar_prefetch = 0 : i64, scratch_operands = 0 : i64, tpu.core_type = #tpu.core_type<tc>, window_params = [{pipeline_mode = #tpu.pipeline_mode<synchronous>, transform_indices = @transform_0, window_bounds = array<i64: 16, 32>}, {pipeline_mode = #tpu.pipeline_mode<synchronous>, transform_indices = @transform_1, window_bounds = array<i64: 16, 32>}, {pipeline_mode = #tpu.pipeline_mode<synchronous>, transform_indices = @transform_2, window_bounds = array<i64: 32, 384>}, {pipeline_mode = #tpu.pipeline_mode<synchronous>, transform_indices = @transform_3, window_bounds = array<i64: 128, 32>}, {pipeline_mode = #tpu.pipeline_mode<synchronous>, transform_indices = @transform_4, window_bounds = array<i64: 1, 608>}, {pipeline_mode = #tpu.pipeline_mode<synchronous>, transform_indices = @transform_5, window_bounds = array<i64: 2, 256>}]} {
    %c0 = arith.constant 0 : index
    %c0_0 = arith.constant 0 : index
    %0 = vector.load %arg1[%c0, %c0_0] : memref<16x32xf32, #tpu.memory_space<vmem>>, vector<16x32xf32>
    %c0_1 = arith.constant 0 : index
    %c0_2 = arith.constant 0 : index
    %1 = vector.load %arg2[%c0_1, %c0_2] : memref<16x32xf32, #tpu.memory_space<vmem>>, vector<16x32xf32>
    %c0_3 = arith.constant 0 : index
    %c0_4 = arith.constant 0 : index
    %2 = vector.load %arg3[%c0_3, %c0_4] : memref<32x384xf32, #tpu.memory_space<vmem>>, vector<32x96xf32>
    %cst = arith.constant dense<0.000000e+00> : vector<16x96xf32>
    %3 = tpu.matmul %0, %2, %cst {dimension_numbers = #tpu.dot_dimension_numbers<[1], [0], [0], [1], [0, 0, 1, 1], [], []>} : vector<16x32xf32>, vector<32x96xf32>, vector<16x96xf32> -> vector<16x96xf32>
    %c0_5 = arith.constant 0 : index
    %c0_6 = arith.constant 0 : index
    %4 = vector.load %arg5[%c0_5, %c0_6] : memref<1x608xf32, #tpu.memory_space<vmem>>, vector<1x96xf32>
    %5 = vector.broadcast %4 : vector<1x96xf32> to vector<16x96xf32>
    %6 = arith.addf %3, %5 : vector<16x96xf32>
    %7 = vector.extract_strided_slice %6 {offsets = [0, 0], sizes = [16, 32], strides = [1, 1]} : vector<16x96xf32> to vector<16x32xf32>
    %8 = vector.extract_strided_slice %6 {offsets = [0, 32], sizes = [16, 32], strides = [1, 1]} : vector<16x96xf32> to vector<16x32xf32>
    %9 = vector.extract_strided_slice %6 {offsets = [0, 64], sizes = [16, 32], strides = [1, 1]} : vector<16x96xf32> to vector<16x32xf32>
    %10 = vector.extract_strided_slice %7 {offsets = [0, 0], sizes = [8, 8], strides = [1, 1]} : vector<16x32xf32> to vector<8x8xf32>
    %11 = vector.extract_strided_slice %7 {offsets = [0, 8], sizes = [8, 8], strides = [1, 1]} : vector<16x32xf32> to vector<8x8xf32>
    %12 = vector.extract_strided_slice %7 {offsets = [0, 16], sizes = [8, 8], strides = [1, 1]} : vector<16x32xf32> to vector<8x8xf32>
    %13 = vector.extract_strided_slice %7 {offsets = [0, 24], sizes = [8, 8], strides = [1, 1]} : vector<16x32xf32> to vector<8x8xf32>
    %14 = vector.extract_strided_slice %7 {offsets = [8, 0], sizes = [8, 8], strides = [1, 1]} : vector<16x32xf32> to vector<8x8xf32>
    %15 = vector.extract_strided_slice %7 {offsets = [8, 8], sizes = [8, 8], strides = [1, 1]} : vector<16x32xf32> to vector<8x8xf32>
    %16 = vector.extract_strided_slice %7 {offsets = [8, 16], sizes = [8, 8], strides = [1, 1]} : vector<16x32xf32> to vector<8x8xf32>
    %17 = vector.extract_strided_slice %7 {offsets = [8, 24], sizes = [8, 8], strides = [1, 1]} : vector<16x32xf32> to vector<8x8xf32>
    %18 = vector.shape_cast %10 : vector<8x8xf32> to vector<1x8x8xf32>
    %19 = vector.shape_cast %11 : vector<8x8xf32> to vector<1x8x8xf32>
    %20 = vector.shape_cast %12 : vector<8x8xf32> to vector<1x8x8xf32>
    %21 = vector.shape_cast %13 : vector<8x8xf32> to vector<1x8x8xf32>
    %22 = vector.shape_cast %14 : vector<8x8xf32> to vector<1x8x8xf32>
    %23 = vector.shape_cast %15 : vector<8x8xf32> to vector<1x8x8xf32>
    %24 = vector.shape_cast %16 : vector<8x8xf32> to vector<1x8x8xf32>
    %25 = vector.shape_cast %17 : vector<8x8xf32> to vector<1x8x8xf32>
    %26 = tpu.concatenate %18, %19, %20, %21, %22, %23, %24, %25 in 0 : vector<1x8x8xf32>, vector<1x8x8xf32>, vector<1x8x8xf32>, vector<1x8x8xf32>, vector<1x8x8xf32>, vector<1x8x8xf32>, vector<1x8x8xf32>, vector<1x8x8xf32> -> vector<8x8x8xf32>
    %27 = vector.extract_strided_slice %8 {offsets = [0, 0], sizes = [8, 8], strides = [1, 1]} : vector<16x32xf32> to vector<8x8xf32>
    %28 = vector.extract_strided_slice %8 {offsets = [0, 8], sizes = [8, 8], strides = [1, 1]} : vector<16x32xf32> to vector<8x8xf32>
    %29 = vector.extract_strided_slice %8 {offsets = [0, 16], sizes = [8, 8], strides = [1, 1]} : vector<16x32xf32> to vector<8x8xf32>
    %30 = vector.extract_strided_slice %8 {offsets = [0, 24], sizes = [8, 8], strides = [1, 1]} : vector<16x32xf32> to vector<8x8xf32>
    %31 = vector.extract_strided_slice %8 {offsets = [8, 0], sizes = [8, 8], strides = [1, 1]} : vector<16x32xf32> to vector<8x8xf32>
    %32 = vector.extract_strided_slice %8 {offsets = [8, 8], sizes = [8, 8], strides = [1, 1]} : vector<16x32xf32> to vector<8x8xf32>
    %33 = vector.extract_strided_slice %8 {offsets = [8, 16], sizes = [8, 8], strides = [1, 1]} : vector<16x32xf32> to vector<8x8xf32>
    %34 = vector.extract_strided_slice %8 {offsets = [8, 24], sizes = [8, 8], strides = [1, 1]} : vector<16x32xf32> to vector<8x8xf32>
    %35 = vector.shape_cast %27 : vector<8x8xf32> to vector<1x8x8xf32>
    %36 = vector.shape_cast %28 : vector<8x8xf32> to vector<1x8x8xf32>
    %37 = vector.shape_cast %29 : vector<8x8xf32> to vector<1x8x8xf32>
    %38 = vector.shape_cast %30 : vector<8x8xf32> to vector<1x8x8xf32>
    %39 = vector.shape_cast %31 : vector<8x8xf32> to vector<1x8x8xf32>
    %40 = vector.shape_cast %32 : vector<8x8xf32> to vector<1x8x8xf32>
    %41 = vector.shape_cast %33 : vector<8x8xf32> to vector<1x8x8xf32>
    %42 = vector.shape_cast %34 : vector<8x8xf32> to vector<1x8x8xf32>
    %43 = tpu.concatenate %35, %36, %37, %38, %39, %40, %41, %42 in 0 : vector<1x8x8xf32>, vector<1x8x8xf32>, vector<1x8x8xf32>, vector<1x8x8xf32>, vector<1x8x8xf32>, vector<1x8x8xf32>, vector<1x8x8xf32>, vector<1x8x8xf32> -> vector<8x8x8xf32>
    %44 = vector.extract_strided_slice %9 {offsets = [0, 0], sizes = [8, 8], strides = [1, 1]} : vector<16x32xf32> to vector<8x8xf32>
    %45 = vector.extract_strided_slice %9 {offsets = [0, 8], sizes = [8, 8], strides = [1, 1]} : vector<16x32xf32> to vector<8x8xf32>
    %46 = vector.extract_strided_slice %9 {offsets = [0, 16], sizes = [8, 8], strides = [1, 1]} : vector<16x32xf32> to vector<8x8xf32>
    %47 = vector.extract_strided_slice %9 {offsets = [0, 24], sizes = [8, 8], strides = [1, 1]} : vector<16x32xf32> to vector<8x8xf32>
    %48 = vector.extract_strided_slice %9 {offsets = [8, 0], sizes = [8, 8], strides = [1, 1]} : vector<16x32xf32> to vector<8x8xf32>
    %49 = vector.extract_strided_slice %9 {offsets = [8, 8], sizes = [8, 8], strides = [1, 1]} : vector<16x32xf32> to vector<8x8xf32>
    %50 = vector.extract_strided_slice %9 {offsets = [8, 16], sizes = [8, 8], strides = [1, 1]} : vector<16x32xf32> to vector<8x8xf32>
    %51 = vector.extract_strided_slice %9 {offsets = [8, 24], sizes = [8, 8], strides = [1, 1]} : vector<16x32xf32> to vector<8x8xf32>
    %52 = vector.shape_cast %44 : vector<8x8xf32> to vector<1x8x8xf32>
    %53 = vector.shape_cast %45 : vector<8x8xf32> to vector<1x8x8xf32>
    %54 = vector.shape_cast %46 : vector<8x8xf32> to vector<1x8x8xf32>
    %55 = vector.shape_cast %47 : vector<8x8xf32> to vector<1x8x8xf32>
    %56 = vector.shape_cast %48 : vector<8x8xf32> to vector<1x8x8xf32>
    %57 = vector.shape_cast %49 : vector<8x8xf32> to vector<1x8x8xf32>
    %58 = vector.shape_cast %50 : vector<8x8xf32> to vector<1x8x8xf32>
    %59 = vector.shape_cast %51 : vector<8x8xf32> to vector<1x8x8xf32>
    %60 = tpu.concatenate %52, %53, %54, %55, %56, %57, %58, %59 in 0 : vector<1x8x8xf32>, vector<1x8x8xf32>, vector<1x8x8xf32>, vector<1x8x8xf32>, vector<1x8x8xf32>, vector<1x8x8xf32>, vector<1x8x8xf32>, vector<1x8x8xf32> -> vector<8x8x8xf32>
    "tpu.trace_start"() <{level = 10 : i32, message = "gqd,gkd->gqk"}> : () -> ()
    %cst_7 = arith.constant dense<0.000000e+00> : vector<8x8x8xf32>
    %61 = tpu.matmul %26, %43, %cst_7 {dimension_numbers = #tpu.dot_dimension_numbers<[2], [2], [1], [1], [0, 0, 0, 1, 1, 1], [0], [0]>} : vector<8x8x8xf32>, vector<8x8x8xf32>, vector<8x8x8xf32> -> vector<8x8x8xf32>
    "tpu.trace_stop"() : () -> ()
    %cst_8 = arith.constant 0.353553385 : f32
    %62 = vector.broadcast %cst_8 : f32 to vector<8x8x8xf32>
    %63 = arith.mulf %61, %62 : vector<8x8x8xf32>
    %cst_9 = arith.constant dense<0xFF800000> : vector<8x8xf32>
    %64 = vector.multi_reduction <maximumf>, %63, %cst_9 [2] : vector<8x8x8xf32> to vector<8x8xf32>
    %65 = vector.shape_cast %64 : vector<8x8xf32> to vector<8x8x1xf32>
    %66 = vector.broadcast %65 : vector<8x8x1xf32> to vector<8x8x8xf32>
    %67 = arith.subf %63, %66 : vector<8x8x8xf32>
    %68 = math.exp %67 : vector<8x8x8xf32>
    %cst_10 = arith.constant dense<0.000000e+00> : vector<8x8xf32>
    %69 = vector.multi_reduction <add>, %68, %cst_10 [2] : vector<8x8x8xf32> to vector<8x8xf32>
    %70 = vector.shape_cast %69 : vector<8x8xf32> to vector<8x8x1xf32>
    %71 = tpu.reciprocal %70 {approx = true} : vector<8x8x1xf32> -> vector<8x8x1xf32>
    %72 = vector.broadcast %71 : vector<8x8x1xf32> to vector<8x8x8xf32>
    %73 = arith.mulf %68, %72 : vector<8x8x8xf32>
    "tpu.trace_start"() <{level = 10 : i32, message = "gqk,gkd->gqd"}> : () -> ()
    %cst_11 = arith.constant dense<0.000000e+00> : vector<8x8x8xf32>
    %74 = tpu.matmul %73, %60, %cst_11 {dimension_numbers = #tpu.dot_dimension_numbers<[2], [1], [1], [2], [0, 0, 0, 1, 1, 2], [0], [0]>} : vector<8x8x8xf32>, vector<8x8x8xf32>, vector<8x8x8xf32> -> vector<8x8x8xf32>
    "tpu.trace_stop"() : () -> ()
    %75 = vector.extract_strided_slice %74 {offsets = [0, 0, 0], sizes = [1, 8, 8], strides = [1, 1, 1]} : vector<8x8x8xf32> to vector<1x8x8xf32>
    %76 = vector.shape_cast %75 : vector<1x8x8xf32> to vector<8x8xf32>
    %77 = vector.extract_strided_slice %74 {offsets = [1, 0, 0], sizes = [1, 8, 8], strides = [1, 1, 1]} : vector<8x8x8xf32> to vector<1x8x8xf32>
    %78 = vector.shape_cast %77 : vector<1x8x8xf32> to vector<8x8xf32>
    %79 = vector.extract_strided_slice %74 {offsets = [2, 0, 0], sizes = [1, 8, 8], strides = [1, 1, 1]} : vector<8x8x8xf32> to vector<1x8x8xf32>
    %80 = vector.shape_cast %79 : vector<1x8x8xf32> to vector<8x8xf32>
    %81 = vector.extract_strided_slice %74 {offsets = [3, 0, 0], sizes = [1, 8, 8], strides = [1, 1, 1]} : vector<8x8x8xf32> to vector<1x8x8xf32>
    %82 = vector.shape_cast %81 : vector<1x8x8xf32> to vector<8x8xf32>
    %83 = tpu.concatenate %76, %78, %80, %82 in 1 : vector<8x8xf32>, vector<8x8xf32>, vector<8x8xf32>, vector<8x8xf32> -> vector<8x32xf32>
    %84 = vector.extract_strided_slice %74 {offsets = [4, 0, 0], sizes = [1, 8, 8], strides = [1, 1, 1]} : vector<8x8x8xf32> to vector<1x8x8xf32>
    %85 = vector.shape_cast %84 : vector<1x8x8xf32> to vector<8x8xf32>
    %86 = vector.extract_strided_slice %74 {offsets = [5, 0, 0], sizes = [1, 8, 8], strides = [1, 1, 1]} : vector<8x8x8xf32> to vector<1x8x8xf32>
    %87 = vector.shape_cast %86 : vector<1x8x8xf32> to vector<8x8xf32>
    %88 = vector.extract_strided_slice %74 {offsets = [6, 0, 0], sizes = [1, 8, 8], strides = [1, 1, 1]} : vector<8x8x8xf32> to vector<1x8x8xf32>
    %89 = vector.shape_cast %88 : vector<1x8x8xf32> to vector<8x8xf32>
    %90 = vector.extract_strided_slice %74 {offsets = [7, 0, 0], sizes = [1, 8, 8], strides = [1, 1, 1]} : vector<8x8x8xf32> to vector<1x8x8xf32>
    %91 = vector.shape_cast %90 : vector<1x8x8xf32> to vector<8x8xf32>
    %92 = tpu.concatenate %85, %87, %89, %91 in 1 : vector<8x8xf32>, vector<8x8xf32>, vector<8x8xf32>, vector<8x8xf32> -> vector<8x32xf32>
    %93 = tpu.concatenate %83, %92 in 0 : vector<8x32xf32>, vector<8x32xf32> -> vector<16x32xf32>
    %c0_12 = arith.constant 0 : index
    %c96 = arith.constant 96 : index
    %94 = vector.load %arg3[%c0_12, %c96] : memref<32x384xf32, #tpu.memory_space<vmem>>, vector<32x32xf32>
    %cst_13 = arith.constant dense<0.000000e+00> : vector<16x32xf32>
    %95 = tpu.matmul %93, %94, %cst_13 {dimension_numbers = #tpu.dot_dimension_numbers<[1], [0], [0], [1], [0, 0, 1, 1], [], []>} : vector<16x32xf32>, vector<32x32xf32>, vector<16x32xf32> -> vector<16x32xf32>
    %c0_14 = arith.constant 0 : index
    %c96_15 = arith.constant 96 : index
    %96 = vector.load %arg5[%c0_14, %c96_15] : memref<1x608xf32, #tpu.memory_space<vmem>>, vector<1x32xf32>
    %97 = vector.broadcast %96 : vector<1x32xf32> to vector<16x32xf32>
    %98 = arith.addf %95, %97 : vector<16x32xf32>
    %99 = arith.addf %0, %98 : vector<16x32xf32>
    %c0_16 = arith.constant 0 : index
    %c416 = arith.constant 416 : index
    %100 = vector.load %arg5[%c0_16, %c416] : memref<1x608xf32, #tpu.memory_space<vmem>>, vector<1x32xf32>
    %c0_17 = arith.constant 0 : index
    %c448 = arith.constant 448 : index
    %101 = vector.load %arg5[%c0_17, %c448] : memref<1x608xf32, #tpu.memory_space<vmem>>, vector<1x32xf32>
    %cst_18 = arith.constant dense<0.000000e+00> : vector<16xf32>
    %102 = vector.multi_reduction <add>, %99, %cst_18 [1] : vector<16x32xf32> to vector<16xf32>
    %103 = vector.shape_cast %102 : vector<16xf32> to vector<16x1xf32>
    %cst_19 = arith.constant 3.200000e+01 : f32
    %104 = vector.broadcast %cst_19 : f32 to vector<16x1xf32>
    %105 = arith.divf %103, %104 : vector<16x1xf32>
    %106 = vector.broadcast %105 : vector<16x1xf32> to vector<16x32xf32>
    %107 = arith.subf %99, %106 : vector<16x32xf32>
    %108 = arith.mulf %107, %107 : vector<16x32xf32>
    %cst_20 = arith.constant dense<0.000000e+00> : vector<16xf32>
    %109 = vector.multi_reduction <add>, %108, %cst_20 [1] : vector<16x32xf32> to vector<16xf32>
    %110 = vector.shape_cast %109 : vector<16xf32> to vector<16x1xf32>
    %cst_21 = arith.constant 3.200000e+01 : f32
    %111 = vector.broadcast %cst_21 : f32 to vector<16x1xf32>
    %112 = arith.divf %110, %111 : vector<16x1xf32>
    %cst_22 = arith.constant 9.99999974E-6 : f32
    %113 = vector.broadcast %cst_22 : f32 to vector<16x1xf32>
    %114 = arith.addf %112, %113 : vector<16x1xf32>
    %115 = math.rsqrt %114 : vector<16x1xf32>
    %116 = vector.broadcast %115 : vector<16x1xf32> to vector<16x32xf32>
    %117 = arith.mulf %107, %116 : vector<16x32xf32>
    %118 = vector.broadcast %100 : vector<1x32xf32> to vector<16x32xf32>
    %119 = arith.mulf %117, %118 : vector<16x32xf32>
    %120 = vector.broadcast %101 : vector<1x32xf32> to vector<16x32xf32>
    %121 = arith.addf %119, %120 : vector<16x32xf32>
    %c0_23 = arith.constant 0 : index
    %c128 = arith.constant 128 : index
    %122 = vector.load %arg3[%c0_23, %c128] : memref<32x384xf32, #tpu.memory_space<vmem>>, vector<32x32xf32>
    %cst_24 = arith.constant dense<0.000000e+00> : vector<16x32xf32>
    %123 = tpu.matmul %121, %122, %cst_24 {dimension_numbers = #tpu.dot_dimension_numbers<[1], [0], [0], [1], [0, 0, 1, 1], [], []>} : vector<16x32xf32>, vector<32x32xf32>, vector<16x32xf32> -> vector<16x32xf32>
    %c0_25 = arith.constant 0 : index
    %c128_26 = arith.constant 128 : index
    %124 = vector.load %arg5[%c0_25, %c128_26] : memref<1x608xf32, #tpu.memory_space<vmem>>, vector<1x32xf32>
    %125 = vector.broadcast %124 : vector<1x32xf32> to vector<16x32xf32>
    %126 = arith.addf %123, %125 : vector<16x32xf32>
    %c0_27 = arith.constant 0 : index
    %c160 = arith.constant 160 : index
    %127 = vector.load %arg3[%c0_27, %c160] : memref<32x384xf32, #tpu.memory_space<vmem>>, vector<32x64xf32>
    %cst_28 = arith.constant dense<0.000000e+00> : vector<16x64xf32>
    %128 = tpu.matmul %1, %127, %cst_28 {dimension_numbers = #tpu.dot_dimension_numbers<[1], [0], [0], [1], [0, 0, 1, 1], [], []>} : vector<16x32xf32>, vector<32x64xf32>, vector<16x64xf32> -> vector<16x64xf32>
    %c0_29 = arith.constant 0 : index
    %c160_30 = arith.constant 160 : index
    %129 = vector.load %arg5[%c0_29, %c160_30] : memref<1x608xf32, #tpu.memory_space<vmem>>, vector<1x64xf32>
    %130 = vector.broadcast %129 : vector<1x64xf32> to vector<16x64xf32>
    %131 = arith.addf %128, %130 : vector<16x64xf32>
    %132 = vector.extract_strided_slice %131 {offsets = [0, 0], sizes = [16, 32], strides = [1, 1]} : vector<16x64xf32> to vector<16x32xf32>
    %133 = vector.extract_strided_slice %131 {offsets = [0, 32], sizes = [16, 32], strides = [1, 1]} : vector<16x64xf32> to vector<16x32xf32>
    %134 = vector.extract_strided_slice %126 {offsets = [0, 0], sizes = [8, 8], strides = [1, 1]} : vector<16x32xf32> to vector<8x8xf32>
    %135 = vector.extract_strided_slice %126 {offsets = [0, 8], sizes = [8, 8], strides = [1, 1]} : vector<16x32xf32> to vector<8x8xf32>
    %136 = vector.extract_strided_slice %126 {offsets = [0, 16], sizes = [8, 8], strides = [1, 1]} : vector<16x32xf32> to vector<8x8xf32>
    %137 = vector.extract_strided_slice %126 {offsets = [0, 24], sizes = [8, 8], strides = [1, 1]} : vector<16x32xf32> to vector<8x8xf32>
    %138 = vector.extract_strided_slice %126 {offsets = [8, 0], sizes = [8, 8], strides = [1, 1]} : vector<16x32xf32> to vector<8x8xf32>
    %139 = vector.extract_strided_slice %126 {offsets = [8, 8], sizes = [8, 8], strides = [1, 1]} : vector<16x32xf32> to vector<8x8xf32>
    %140 = vector.extract_strided_slice %126 {offsets = [8, 16], sizes = [8, 8], strides = [1, 1]} : vector<16x32xf32> to vector<8x8xf32>
    %141 = vector.extract_strided_slice %126 {offsets = [8, 24], sizes = [8, 8], strides = [1, 1]} : vector<16x32xf32> to vector<8x8xf32>
    %142 = vector.shape_cast %134 : vector<8x8xf32> to vector<1x8x8xf32>
    %143 = vector.shape_cast %135 : vector<8x8xf32> to vector<1x8x8xf32>
    %144 = vector.shape_cast %136 : vector<8x8xf32> to vector<1x8x8xf32>
    %145 = vector.shape_cast %137 : vector<8x8xf32> to vector<1x8x8xf32>
    %146 = vector.shape_cast %138 : vector<8x8xf32> to vector<1x8x8xf32>
    %147 = vector.shape_cast %139 : vector<8x8xf32> to vector<1x8x8xf32>
    %148 = vector.shape_cast %140 : vector<8x8xf32> to vector<1x8x8xf32>
    %149 = vector.shape_cast %141 : vector<8x8xf32> to vector<1x8x8xf32>
    %150 = tpu.concatenate %142, %143, %144, %145, %146, %147, %148, %149 in 0 : vector<1x8x8xf32>, vector<1x8x8xf32>, vector<1x8x8xf32>, vector<1x8x8xf32>, vector<1x8x8xf32>, vector<1x8x8xf32>, vector<1x8x8xf32>, vector<1x8x8xf32> -> vector<8x8x8xf32>
    %151 = vector.extract_strided_slice %132 {offsets = [0, 0], sizes = [8, 8], strides = [1, 1]} : vector<16x32xf32> to vector<8x8xf32>
    %152 = vector.extract_strided_slice %132 {offsets = [0, 8], sizes = [8, 8], strides = [1, 1]} : vector<16x32xf32> to vector<8x8xf32>
    %153 = vector.extract_strided_slice %132 {offsets = [0, 16], sizes = [8, 8], strides = [1, 1]} : vector<16x32xf32> to vector<8x8xf32>
    %154 = vector.extract_strided_slice %132 {offsets = [0, 24], sizes = [8, 8], strides = [1, 1]} : vector<16x32xf32> to vector<8x8xf32>
    %155 = vector.extract_strided_slice %132 {offsets = [8, 0], sizes = [8, 8], strides = [1, 1]} : vector<16x32xf32> to vector<8x8xf32>
    %156 = vector.extract_strided_slice %132 {offsets = [8, 8], sizes = [8, 8], strides = [1, 1]} : vector<16x32xf32> to vector<8x8xf32>
    %157 = vector.extract_strided_slice %132 {offsets = [8, 16], sizes = [8, 8], strides = [1, 1]} : vector<16x32xf32> to vector<8x8xf32>
    %158 = vector.extract_strided_slice %132 {offsets = [8, 24], sizes = [8, 8], strides = [1, 1]} : vector<16x32xf32> to vector<8x8xf32>
    %159 = vector.shape_cast %151 : vector<8x8xf32> to vector<1x8x8xf32>
    %160 = vector.shape_cast %152 : vector<8x8xf32> to vector<1x8x8xf32>
    %161 = vector.shape_cast %153 : vector<8x8xf32> to vector<1x8x8xf32>
    %162 = vector.shape_cast %154 : vector<8x8xf32> to vector<1x8x8xf32>
    %163 = vector.shape_cast %155 : vector<8x8xf32> to vector<1x8x8xf32>
    %164 = vector.shape_cast %156 : vector<8x8xf32> to vector<1x8x8xf32>
    %165 = vector.shape_cast %157 : vector<8x8xf32> to vector<1x8x8xf32>
    %166 = vector.shape_cast %158 : vector<8x8xf32> to vector<1x8x8xf32>
    %167 = tpu.concatenate %159, %160, %161, %162, %163, %164, %165, %166 in 0 : vector<1x8x8xf32>, vector<1x8x8xf32>, vector<1x8x8xf32>, vector<1x8x8xf32>, vector<1x8x8xf32>, vector<1x8x8xf32>, vector<1x8x8xf32>, vector<1x8x8xf32> -> vector<8x8x8xf32>
    %168 = vector.extract_strided_slice %133 {offsets = [0, 0], sizes = [8, 8], strides = [1, 1]} : vector<16x32xf32> to vector<8x8xf32>
    %169 = vector.extract_strided_slice %133 {offsets = [0, 8], sizes = [8, 8], strides = [1, 1]} : vector<16x32xf32> to vector<8x8xf32>
    %170 = vector.extract_strided_slice %133 {offsets = [0, 16], sizes = [8, 8], strides = [1, 1]} : vector<16x32xf32> to vector<8x8xf32>
    %171 = vector.extract_strided_slice %133 {offsets = [0, 24], sizes = [8, 8], strides = [1, 1]} : vector<16x32xf32> to vector<8x8xf32>
    %172 = vector.extract_strided_slice %133 {offsets = [8, 0], sizes = [8, 8], strides = [1, 1]} : vector<16x32xf32> to vector<8x8xf32>
    %173 = vector.extract_strided_slice %133 {offsets = [8, 8], sizes = [8, 8], strides = [1, 1]} : vector<16x32xf32> to vector<8x8xf32>
    %174 = vector.extract_strided_slice %133 {offsets = [8, 16], sizes = [8, 8], strides = [1, 1]} : vector<16x32xf32> to vector<8x8xf32>
    %175 = vector.extract_strided_slice %133 {offsets = [8, 24], sizes = [8, 8], strides = [1, 1]} : vector<16x32xf32> to vector<8x8xf32>
    %176 = vector.shape_cast %168 : vector<8x8xf32> to vector<1x8x8xf32>
    %177 = vector.shape_cast %169 : vector<8x8xf32> to vector<1x8x8xf32>
    %178 = vector.shape_cast %170 : vector<8x8xf32> to vector<1x8x8xf32>
    %179 = vector.shape_cast %171 : vector<8x8xf32> to vector<1x8x8xf32>
    %180 = vector.shape_cast %172 : vector<8x8xf32> to vector<1x8x8xf32>
    %181 = vector.shape_cast %173 : vector<8x8xf32> to vector<1x8x8xf32>
    %182 = vector.shape_cast %174 : vector<8x8xf32> to vector<1x8x8xf32>
    %183 = vector.shape_cast %175 : vector<8x8xf32> to vector<1x8x8xf32>
    %184 = tpu.concatenate %176, %177, %178, %179, %180, %181, %182, %183 in 0 : vector<1x8x8xf32>, vector<1x8x8xf32>, vector<1x8x8xf32>, vector<1x8x8xf32>, vector<1x8x8xf32>, vector<1x8x8xf32>, vector<1x8x8xf32>, vector<1x8x8xf32> -> vector<8x8x8xf32>
    "tpu.trace_start"() <{level = 10 : i32, message = "gqd,gkd->gqk"}> : () -> ()
    %cst_31 = arith.constant dense<0.000000e+00> : vector<8x8x8xf32>
    %185 = tpu.matmul %150, %167, %cst_31 {dimension_numbers = #tpu.dot_dimension_numbers<[2], [2], [1], [1], [0, 0, 0, 1, 1, 1], [0], [0]>} : vector<8x8x8xf32>, vector<8x8x8xf32>, vector<8x8x8xf32> -> vector<8x8x8xf32>
    "tpu.trace_stop"() : () -> ()
    %cst_32 = arith.constant 0.353553385 : f32
    %186 = vector.broadcast %cst_32 : f32 to vector<8x8x8xf32>
    %187 = arith.mulf %185, %186 : vector<8x8x8xf32>
    %cst_33 = arith.constant dense<0xFF800000> : vector<8x8xf32>
    %188 = vector.multi_reduction <maximumf>, %187, %cst_33 [2] : vector<8x8x8xf32> to vector<8x8xf32>
    %189 = vector.shape_cast %188 : vector<8x8xf32> to vector<8x8x1xf32>
    %190 = vector.broadcast %189 : vector<8x8x1xf32> to vector<8x8x8xf32>
    %191 = arith.subf %187, %190 : vector<8x8x8xf32>
    %192 = math.exp %191 : vector<8x8x8xf32>
    %cst_34 = arith.constant dense<0.000000e+00> : vector<8x8xf32>
    %193 = vector.multi_reduction <add>, %192, %cst_34 [2] : vector<8x8x8xf32> to vector<8x8xf32>
    %194 = vector.shape_cast %193 : vector<8x8xf32> to vector<8x8x1xf32>
    %195 = tpu.reciprocal %194 {approx = true} : vector<8x8x1xf32> -> vector<8x8x1xf32>
    %196 = vector.broadcast %195 : vector<8x8x1xf32> to vector<8x8x8xf32>
    %197 = arith.mulf %192, %196 : vector<8x8x8xf32>
    "tpu.trace_start"() <{level = 10 : i32, message = "gqk,gkd->gqd"}> : () -> ()
    %cst_35 = arith.constant dense<0.000000e+00> : vector<8x8x8xf32>
    %198 = tpu.matmul %197, %184, %cst_35 {dimension_numbers = #tpu.dot_dimension_numbers<[2], [1], [1], [2], [0, 0, 0, 1, 1, 2], [0], [0]>} : vector<8x8x8xf32>, vector<8x8x8xf32>, vector<8x8x8xf32> -> vector<8x8x8xf32>
    "tpu.trace_stop"() : () -> ()
    %199 = vector.extract_strided_slice %198 {offsets = [0, 0, 0], sizes = [1, 8, 8], strides = [1, 1, 1]} : vector<8x8x8xf32> to vector<1x8x8xf32>
    %200 = vector.shape_cast %199 : vector<1x8x8xf32> to vector<8x8xf32>
    %201 = vector.extract_strided_slice %198 {offsets = [1, 0, 0], sizes = [1, 8, 8], strides = [1, 1, 1]} : vector<8x8x8xf32> to vector<1x8x8xf32>
    %202 = vector.shape_cast %201 : vector<1x8x8xf32> to vector<8x8xf32>
    %203 = vector.extract_strided_slice %198 {offsets = [2, 0, 0], sizes = [1, 8, 8], strides = [1, 1, 1]} : vector<8x8x8xf32> to vector<1x8x8xf32>
    %204 = vector.shape_cast %203 : vector<1x8x8xf32> to vector<8x8xf32>
    %205 = vector.extract_strided_slice %198 {offsets = [3, 0, 0], sizes = [1, 8, 8], strides = [1, 1, 1]} : vector<8x8x8xf32> to vector<1x8x8xf32>
    %206 = vector.shape_cast %205 : vector<1x8x8xf32> to vector<8x8xf32>
    %207 = tpu.concatenate %200, %202, %204, %206 in 1 : vector<8x8xf32>, vector<8x8xf32>, vector<8x8xf32>, vector<8x8xf32> -> vector<8x32xf32>
    %208 = vector.extract_strided_slice %198 {offsets = [4, 0, 0], sizes = [1, 8, 8], strides = [1, 1, 1]} : vector<8x8x8xf32> to vector<1x8x8xf32>
    %209 = vector.shape_cast %208 : vector<1x8x8xf32> to vector<8x8xf32>
    %210 = vector.extract_strided_slice %198 {offsets = [5, 0, 0], sizes = [1, 8, 8], strides = [1, 1, 1]} : vector<8x8x8xf32> to vector<1x8x8xf32>
    %211 = vector.shape_cast %210 : vector<1x8x8xf32> to vector<8x8xf32>
    %212 = vector.extract_strided_slice %198 {offsets = [6, 0, 0], sizes = [1, 8, 8], strides = [1, 1, 1]} : vector<8x8x8xf32> to vector<1x8x8xf32>
    %213 = vector.shape_cast %212 : vector<1x8x8xf32> to vector<8x8xf32>
    %214 = vector.extract_strided_slice %198 {offsets = [7, 0, 0], sizes = [1, 8, 8], strides = [1, 1, 1]} : vector<8x8x8xf32> to vector<1x8x8xf32>
    %215 = vector.shape_cast %214 : vector<1x8x8xf32> to vector<8x8xf32>
    %216 = tpu.concatenate %209, %211, %213, %215 in 1 : vector<8x8xf32>, vector<8x8xf32>, vector<8x8xf32>, vector<8x8xf32> -> vector<8x32xf32>
    %217 = tpu.concatenate %207, %216 in 0 : vector<8x32xf32>, vector<8x32xf32> -> vector<16x32xf32>
    %c0_36 = arith.constant 0 : index
    %c224 = arith.constant 224 : index
    %218 = vector.load %arg3[%c0_36, %c224] : memref<32x384xf32, #tpu.memory_space<vmem>>, vector<32x32xf32>
    %cst_37 = arith.constant dense<0.000000e+00> : vector<16x32xf32>
    %219 = tpu.matmul %217, %218, %cst_37 {dimension_numbers = #tpu.dot_dimension_numbers<[1], [0], [0], [1], [0, 0, 1, 1], [], []>} : vector<16x32xf32>, vector<32x32xf32>, vector<16x32xf32> -> vector<16x32xf32>
    %c0_38 = arith.constant 0 : index
    %c224_39 = arith.constant 224 : index
    %220 = vector.load %arg5[%c0_38, %c224_39] : memref<1x608xf32, #tpu.memory_space<vmem>>, vector<1x32xf32>
    %221 = vector.broadcast %220 : vector<1x32xf32> to vector<16x32xf32>
    %222 = arith.addf %219, %221 : vector<16x32xf32>
    %223 = arith.addf %121, %222 : vector<16x32xf32>
    %c0_40 = arith.constant 0 : index
    %c480 = arith.constant 480 : index
    %224 = vector.load %arg5[%c0_40, %c480] : memref<1x608xf32, #tpu.memory_space<vmem>>, vector<1x32xf32>
    %c0_41 = arith.constant 0 : index
    %c512 = arith.constant 512 : index
    %225 = vector.load %arg5[%c0_41, %c512] : memref<1x608xf32, #tpu.memory_space<vmem>>, vector<1x32xf32>
    %cst_42 = arith.constant dense<0.000000e+00> : vector<16xf32>
    %226 = vector.multi_reduction <add>, %223, %cst_42 [1] : vector<16x32xf32> to vector<16xf32>
    %227 = vector.shape_cast %226 : vector<16xf32> to vector<16x1xf32>
    %cst_43 = arith.constant 3.200000e+01 : f32
    %228 = vector.broadcast %cst_43 : f32 to vector<16x1xf32>
    %229 = arith.divf %227, %228 : vector<16x1xf32>
    %230 = vector.broadcast %229 : vector<16x1xf32> to vector<16x32xf32>
    %231 = arith.subf %223, %230 : vector<16x32xf32>
    %232 = arith.mulf %231, %231 : vector<16x32xf32>
    %cst_44 = arith.constant dense<0.000000e+00> : vector<16xf32>
    %233 = vector.multi_reduction <add>, %232, %cst_44 [1] : vector<16x32xf32> to vector<16xf32>
    %234 = vector.shape_cast %233 : vector<16xf32> to vector<16x1xf32>
    %cst_45 = arith.constant 3.200000e+01 : f32
    %235 = vector.broadcast %cst_45 : f32 to vector<16x1xf32>
    %236 = arith.divf %234, %235 : vector<16x1xf32>
    %cst_46 = arith.constant 9.99999974E-6 : f32
    %237 = vector.broadcast %cst_46 : f32 to vector<16x1xf32>
    %238 = arith.addf %236, %237 : vector<16x1xf32>
    %239 = math.rsqrt %238 : vector<16x1xf32>
    %240 = vector.broadcast %239 : vector<16x1xf32> to vector<16x32xf32>
    %241 = arith.mulf %231, %240 : vector<16x32xf32>
    %242 = vector.broadcast %224 : vector<1x32xf32> to vector<16x32xf32>
    %243 = arith.mulf %241, %242 : vector<16x32xf32>
    %244 = vector.broadcast %225 : vector<1x32xf32> to vector<16x32xf32>
    %245 = arith.addf %243, %244 : vector<16x32xf32>
    %c0_47 = arith.constant 0 : index
    %c256 = arith.constant 256 : index
    %246 = vector.load %arg3[%c0_47, %c256] : memref<32x384xf32, #tpu.memory_space<vmem>>, vector<32x128xf32>
    %cst_48 = arith.constant dense<0.000000e+00> : vector<16x128xf32>
    %247 = tpu.matmul %245, %246, %cst_48 {dimension_numbers = #tpu.dot_dimension_numbers<[1], [0], [0], [1], [0, 0, 1, 1], [], []>} : vector<16x32xf32>, vector<32x128xf32>, vector<16x128xf32> -> vector<16x128xf32>
    %c0_49 = arith.constant 0 : index
    %c256_50 = arith.constant 256 : index
    %248 = vector.load %arg5[%c0_49, %c256_50] : memref<1x608xf32, #tpu.memory_space<vmem>>, vector<1x128xf32>
    %249 = vector.broadcast %248 : vector<1x128xf32> to vector<16x128xf32>
    %250 = arith.addf %247, %249 : vector<16x128xf32>
    %cst_51 = arith.constant 0.000000e+00 : f32
    %251 = vector.broadcast %cst_51 : f32 to vector<16x128xf32>
    %252 = arith.maximumf %250, %251 : vector<16x128xf32>
    %c0_52 = arith.constant 0 : index
    %c0_53 = arith.constant 0 : index
    %253 = vector.load %arg4[%c0_52, %c0_53] : memref<128x32xf32, #tpu.memory_space<vmem>>, vector<128x32xf32>
    %cst_54 = arith.constant dense<0.000000e+00> : vector<16x32xf32>
    %254 = tpu.matmul %252, %253, %cst_54 {dimension_numbers = #tpu.dot_dimension_numbers<[1], [0], [0], [1], [0, 0, 1, 1], [], []>} : vector<16x128xf32>, vector<128x32xf32>, vector<16x32xf32> -> vector<16x32xf32>
    %c0_55 = arith.constant 0 : index
    %c384 = arith.constant 384 : index
    %255 = vector.load %arg5[%c0_55, %c384] : memref<1x608xf32, #tpu.memory_space<vmem>>, vector<1x32xf32>
    %256 = vector.broadcast %255 : vector<1x32xf32> to vector<16x32xf32>
    %257 = arith.addf %254, %256 : vector<16x32xf32>
    %258 = arith.addf %245, %257 : vector<16x32xf32>
    %c0_56 = arith.constant 0 : index
    %c544 = arith.constant 544 : index
    %259 = vector.load %arg5[%c0_56, %c544] : memref<1x608xf32, #tpu.memory_space<vmem>>, vector<1x32xf32>
    %c0_57 = arith.constant 0 : index
    %c576 = arith.constant 576 : index
    %260 = vector.load %arg5[%c0_57, %c576] : memref<1x608xf32, #tpu.memory_space<vmem>>, vector<1x32xf32>
    %cst_58 = arith.constant dense<0.000000e+00> : vector<16xf32>
    %261 = vector.multi_reduction <add>, %258, %cst_58 [1] : vector<16x32xf32> to vector<16xf32>
    %262 = vector.shape_cast %261 : vector<16xf32> to vector<16x1xf32>
    %cst_59 = arith.constant 3.200000e+01 : f32
    %263 = vector.broadcast %cst_59 : f32 to vector<16x1xf32>
    %264 = arith.divf %262, %263 : vector<16x1xf32>
    %265 = vector.broadcast %264 : vector<16x1xf32> to vector<16x32xf32>
    %266 = arith.subf %258, %265 : vector<16x32xf32>
    %267 = arith.mulf %266, %266 : vector<16x32xf32>
    %cst_60 = arith.constant dense<0.000000e+00> : vector<16xf32>
    %268 = vector.multi_reduction <add>, %267, %cst_60 [1] : vector<16x32xf32> to vector<16xf32>
    %269 = vector.shape_cast %268 : vector<16xf32> to vector<16x1xf32>
    %cst_61 = arith.constant 3.200000e+01 : f32
    %270 = vector.broadcast %cst_61 : f32 to vector<16x1xf32>
    %271 = arith.divf %269, %270 : vector<16x1xf32>
    %cst_62 = arith.constant 9.99999974E-6 : f32
    %272 = vector.broadcast %cst_62 : f32 to vector<16x1xf32>
    %273 = arith.addf %271, %272 : vector<16x1xf32>
    %274 = math.rsqrt %273 : vector<16x1xf32>
    %275 = vector.broadcast %274 : vector<16x1xf32> to vector<16x32xf32>
    %276 = arith.mulf %266, %275 : vector<16x32xf32>
    %277 = vector.broadcast %259 : vector<1x32xf32> to vector<16x32xf32>
    %278 = arith.mulf %276, %277 : vector<16x32xf32>
    %279 = vector.broadcast %260 : vector<1x32xf32> to vector<16x32xf32>
    %280 = arith.addf %278, %279 : vector<16x32xf32>
    %281 = vector.extract_strided_slice %280 {offsets = [0, 0], sizes = [1, 32], strides = [1, 1]} : vector<16x32xf32> to vector<1x32xf32>
    %282 = vector.extract_strided_slice %280 {offsets = [1, 0], sizes = [1, 32], strides = [1, 1]} : vector<16x32xf32> to vector<1x32xf32>
    %283 = vector.extract_strided_slice %280 {offsets = [2, 0], sizes = [1, 32], strides = [1, 1]} : vector<16x32xf32> to vector<1x32xf32>
    %284 = vector.extract_strided_slice %280 {offsets = [3, 0], sizes = [1, 32], strides = [1, 1]} : vector<16x32xf32> to vector<1x32xf32>
    %285 = vector.extract_strided_slice %280 {offsets = [4, 0], sizes = [1, 32], strides = [1, 1]} : vector<16x32xf32> to vector<1x32xf32>
    %286 = vector.extract_strided_slice %280 {offsets = [5, 0], sizes = [1, 32], strides = [1, 1]} : vector<16x32xf32> to vector<1x32xf32>
    %287 = vector.extract_strided_slice %280 {offsets = [6, 0], sizes = [1, 32], strides = [1, 1]} : vector<16x32xf32> to vector<1x32xf32>
    %288 = vector.extract_strided_slice %280 {offsets = [7, 0], sizes = [1, 32], strides = [1, 1]} : vector<16x32xf32> to vector<1x32xf32>
    %289 = tpu.concatenate %281, %282, %283, %284, %285, %286, %287, %288 in 1 : vector<1x32xf32>, vector<1x32xf32>, vector<1x32xf32>, vector<1x32xf32>, vector<1x32xf32>, vector<1x32xf32>, vector<1x32xf32>, vector<1x32xf32> -> vector<1x256xf32>
    %290 = vector.extract_strided_slice %280 {offsets = [8, 0], sizes = [1, 32], strides = [1, 1]} : vector<16x32xf32> to vector<1x32xf32>
    %291 = vector.extract_strided_slice %280 {offsets = [9, 0], sizes = [1, 32], strides = [1, 1]} : vector<16x32xf32> to vector<1x32xf32>
    %292 = vector.extract_strided_slice %280 {offsets = [10, 0], sizes = [1, 32], strides = [1, 1]} : vector<16x32xf32> to vector<1x32xf32>
    %293 = vector.extract_strided_slice %280 {offsets = [11, 0], sizes = [1, 32], strides = [1, 1]} : vector<16x32xf32> to vector<1x32xf32>
    %294 = vector.extract_strided_slice %280 {offsets = [12, 0], sizes = [1, 32], strides = [1, 1]} : vector<16x32xf32> to vector<1x32xf32>
    %295 = vector.extract_strided_slice %280 {offsets = [13, 0], sizes = [1, 32], strides = [1, 1]} : vector<16x32xf32> to vector<1x32xf32>
    %296 = vector.extract_strided_slice %280 {offsets = [14, 0], sizes = [1, 32], strides = [1, 1]} : vector<16x32xf32> to vector<1x32xf32>
    %297 = vector.extract_strided_slice %280 {offsets = [15, 0], sizes = [1, 32], strides = [1, 1]} : vector<16x32xf32> to vector<1x32xf32>
    %298 = tpu.concatenate %290, %291, %292, %293, %294, %295, %296, %297 in 1 : vector<1x32xf32>, vector<1x32xf32>, vector<1x32xf32>, vector<1x32xf32>, vector<1x32xf32>, vector<1x32xf32>, vector<1x32xf32>, vector<1x32xf32> -> vector<1x256xf32>
    %299 = tpu.concatenate %289, %298 in 0 : vector<1x256xf32>, vector<1x256xf32> -> vector<2x256xf32>
    %c0_63 = arith.constant 0 : index
    %c0_64 = arith.constant 0 : index
    %300 = vector.load %arg6[%c0_63, %c0_64] : memref<2x256xf32, #tpu.memory_space<vmem>>, vector<2x256xf32>
    tpu.vector_store %arg6[%c0_63, %c0_64], %299 {strides = array<i32>} : memref<2x256xf32, #tpu.memory_space<vmem>>, vector<2x256xf32>,
    return
  }
  func.func @transform_0(%arg0: i32) -> (i32, i32) {
    %c0_i32 = arith.constant 0 : i32
    %c0_i32_0 = arith.constant 0 : i32
    %c0_i32_1 = arith.constant 0 : i32
    return %c0_i32, %c0_i32_0 : i32, i32
  }
  func.func @transform_1(%arg0: i32) -> (i32, i32) {
    %c0_i32 = arith.constant 0 : i32
    %c0_i32_0 = arith.constant 0 : i32
    %c0_i32_1 = arith.constant 0 : i32
    return %c0_i32, %c0_i32_0 : i32, i32
  }
  func.func @transform_2(%arg0: i32) -> (i32, i32) {
    %c0_i32 = arith.constant 0 : i32
    %c0_i32_0 = arith.constant 0 : i32
    %c0_i32_1 = arith.constant 0 : i32
    return %c0_i32, %c0_i32_0 : i32, i32
  }
  func.func @transform_3(%arg0: i32) -> (i32, i32) {
    %c0_i32 = arith.constant 0 : i32
    %c0_i32_0 = arith.constant 0 : i32
    %c0_i32_1 = arith.constant 0 : i32
    return %c0_i32, %c0_i32_0 : i32, i32
  }
  func.func @transform_4(%arg0: i32) -> (i32, i32) {
    %c0_i32 = arith.constant 0 : i32
    %c0_i32_0 = arith.constant 0 : i32
    %c0_i32_1 = arith.constant 0 : i32
    return %c0_i32, %c0_i32_0 : i32, i32
  }
  func.func @transform_5(%arg0: i32) -> (i32, i32) {
    %c0_i32 = arith.constant 0 : i32
    %c0_i32_0 = arith.constant 0 : i32
    %c0_i32_1 = arith.constant 0 : i32
    return %c0_i32, %c0_i32_0 : i32, i32
  }
}

</mosaic_0001>

<bundles_post_ra>
// kernel: tpu_custom_call.1
= control target key start
LH: loop header
LB: loop body
LE: loop exit
PB: predicated region body
PF: predicated region fallthrough
CT: control target
= control target key end

     0   :  { %vm33_vm0 = vcmask 261120   ;;  %s2539_s0 = inlined_call_operand.vmem [shape: f32[16,32], index: 0, kind: input, shape index: {}]   ;;  %s2540_s1 = inlined_call_operand.vmem [shape: f32[16,32], index: 1, kind: input, shape index: {}]   ;;  %s2541_s2 = inlined_call_operand.vmem [shape: f32[32,384], index: 2, kind: input, shape index: {}]   ;;  %s2542_s3 = inlined_call_operand.vmem [shape: f32[128,32], index: 3, kind: input, shape index: {}]   ;;  %s2543_s4 = inlined_call_operand.vmem [shape: f32[1,608], index: 4, kind: input, shape index: {}]   ;;  %s2544_s5 = inlined_call_operand.hbm [shape: f32[2,256], index: 5, kind: output, shape index: {}]  }
   0x1   :  { %v2014_v0 = vld [vmem:[%s2541_s2 + $0x48] sm:$0xff]  ;;  %v2019_v1 = vld [vmem:[%s2541_s2 + $0x30] sm:$0xff]  ;;  %v2025_v2 = vld [vmem:[%s2541_s2 + $0x18] sm:$0xff] }
   0x2   :  { %52 = vmatpush.msra.mxu0 %v2014_v0  ;;  %v2030_v3 = vld [vmem:[%s2541_s2] sm:$0xff] }
   0x3   :  { %v2037_v4 = vld [vmem:[%s2539_s0] sm:$0xff] }
   0x4   :  { %53 = vmatpush.msra.mxu0 %v2019_v1 }
   0x6   :  { %54 = vmatpush.msra.mxu0 %v2025_v2 }
   0x7   :  { %10 = vsyncpa [#allocation3], 0  ;;  %v2045_v5 = vld [vmem:[%s2539_s0 + $0x8] sm:$0xff]  ;;  %v1858_v6 = vld [vmem:[%s2543_s4] ss:$0 sm:$0xff]  ;;  %s1970_s7 = smov 104  }
   0x8   :  { %55 = vmatpush.msra.mxu0 %v2030_v3  ;;  %s1971_s8 = smov 120   ;;  %s1972_s0 = smov 112   ;;  %vm79_vm1 = vcmask 64512   ;;  %vm603_vm2 = vcmask 130048   ;;  %vm605_vm3 = vcmask 195584  }
   0x9   :  { %1732 = vmatmul.msk.f32.vlgmr.msra.gmra.mxu0 %vm33_vm0, %v2037_v4  ;;  %s1973_s9 = smov 96   ;;  %s1974_s10 = smov 64  }
   0xa   :  { %s1975_s11 = smov 32   ;;  %s1976_s12 = smov 8  }
   0xb   :  { %s1977_s13 = smov 24   ;;  %s1978_s14 = smov 16  }
  0x11   :  { %1733 = vmatmul.msk.f32.gmra.mxu0 %vm33_vm0, %v2045_v5 }
  0x86   :  { %v57_v7 = vpop.f32.mrf.mxu0 }
  0x87   :  { %v2052_v8 = vadd.f32 %v1858_v6, %v57_v7 }
  0x89   :  { %68 = vrot.lane.b32.xlu1 %v2052_v8, %s1970_s7  ;;  %64 = vrot.lane.b32.xlu0 %v2052_v8, %s1971_s8 }
  0x8e   :  { %v60_v9 = vpop.f32.mrf.mxu0 }
  0x8f   :  { %v2058_v10 = vadd.f32 %v1858_v6, %v60_v9 }
  0x91   :  { %75 = vrot.lane.b32.xlu1 %v2058_v10, %s1970_s7  ;;  %66 = vrot.lane.b32.xlu0 %v2052_v8, %s1972_s0 }
  0x92   :  { %71 = vrot.lane.b32.xlu2 %v2058_v10, %s1971_s8 }
  0x99   :  { %77 = vrot.lane.b32.xlu1 %v2052_v8, %s1973_s9 }
  0x9a   :  { %73 = vrot.lane.b32.xlu2 %v2058_v10, %s1972_s0 }
  0xa2   :  { %182 = vrot.lane.b32.xlu2 %v2058_v10, %s1973_s9 }
  0xec   :  { %v2072_v11 = vpop.permute.xlu2 %71 }
  0xf4   :  { %v2082_v14 = vpop.permute.xlu2 %73 }
  0xfb   :  { %v2074_v12 = vpop.permute.xlu1 %68  ;;  %v2076_v13 = vpop.permute.xlu0 %64 }
  0xfc   :  { %156 = vrot.lane.b32.xlu1 %v2074_v12, %s1973_s9  ;;  %104 = vrot.lane.b32.xlu0 %v2076_v13, %s1973_s9  ;;  %v183_v18 = vpop.permute.xlu2 %182 }
 0x103   :  { %v2084_v15 = vpop.permute.xlu1 %75  ;;  %v2086_v16 = vpop.permute.xlu0 %66 }
 0x104   :  { %234 = vrot.lane.b32.xlu1 %v2082_v14, %s1973_s9  ;;  %130 = vrot.lane.b32.xlu0 %v2086_v16, %s1973_s9  ;;  %v1808_v49 = vpack.i.bf16 %v2084_v15, %v2086_v16 }
 0x105   :  { %260 = vrot.lane.b32.xlu2 %v2084_v15, %s1973_s9 }
 0x10b   :  { %v78_v17 = vpop.permute.xlu1 %77 }
 0x10c   :  { %1734 = vmatpush.xpose.msk.msra.mxu1 %vm79_vm1, %v78_v17  ;;  %208 = vrot.lane.b32.xlu0 %v2072_v11, %s1973_s9 }
 0x10f   :  { %1735 = vmatmul.msk.f32.vlgmr.msra.gmra.mxu1 %vm79_vm1, %v2052_v8 }
 0x15f   :  { %v261_v21 = vpop.permute.xlu2 %260 }
 0x16e   :  { %v157_v19 = vpop.permute.xlu1 %156  ;;  %v105_v20 = vpop.permute.xlu0 %104 }
 0x16f   :  { %1736 = vmatpush.xpose.msk.msra.mxu2 %vm79_vm1, %v105_v20  ;;  %1740 = vmatpush.xpose.msk.msrb.mxu1 %vm79_vm1, %v157_v19 }
 0x172   :  { %1737 = vmatmul.msk.f32.vlgmr.msra.gmra.mxu2 %vm79_vm1, %v2076_v13  ;;  %1741 = vmatmul.msk.f32.vlgmr.msrb.gmra.mxu1 %vm79_vm1, %v2074_v12 }
 0x173   :  { %1742 = vmatpush.xpose.msk.msrb.mxu2 %vm79_vm1, %v183_v18 }
 0x176   :  { %v235_v22 = vpop.permute.xlu1 %234  ;;  %v131_v23 = vpop.permute.xlu0 %130 }
 0x177   :  { %1748 = vmatpush.xpose.msk.msra.mxu2 %vm79_vm1, %v261_v21  ;;  %1738 = vmatpush.xpose.msk.msra.mxu3 %vm79_vm1, %v131_v23 }
 0x178   :  { %1746 = vmatpush.xpose.msk.msra.mxu1 %vm79_vm1, %v235_v22 }
 0x17a   :  { %1739 = vmatmul.msk.f32.vlgmr.msra.gmra.mxu3 %vm79_vm1, %v2086_v16  ;;  %1743 = vmatmul.msk.f32.vlgmr.msrb.gmra.mxu2 %vm79_vm1, %v2058_v10 }
 0x17b   :  { %1747 = vmatmul.msk.f32.vlgmr.msra.gmra.mxu1 %vm79_vm1, %v2082_v14 }
 0x17e   :  { %v209_v24 = vpop.permute.xlu0 %208 }
 0x17f   :  { %1744 = vmatpush.xpose.msk.msrb.mxu3 %vm79_vm1, %v209_v24 }
 0x182   :  { %1745 = vmatmul.msk.f32.vlgmr.msrb.gmra.mxu3 %vm79_vm1, %v2072_v11  ;;  %1749 = vmatmul.msk.f32.vlgmr.msra.gmra.mxu2 %vm79_vm1, %v2084_v15 }
 0x18c   :  { %v101_v25 = vpop.f32.mrf.mxu1 }
 0x18d   :  { %v2124_v38 = vmul.f32 0.35355338, %v101_v25 }
 0x18f   :  { %v294_v42 = vsel %vm79_vm1, %v2124_v38, -inf }
 0x1ef   :  { %v179_v26 = vpop.f32.mrf.mxu1 }
 0x1f0   :  { %v289_v27 = vmul.f32 0.35355338, %v179_v26 }
 0x1f2   :  { %v303_v28 = vsel %vm79_vm1, %v289_v27, -inf }
 0x1f3   :  { %304 = vmax.xlane.f32.xlu2 %v303_v28 }
 0x1f5   :  { %v127_v29 = vpop.f32.mrf.mxu2 }
 0x1f6   :  { %v287_v30 = vmul.f32 0.35355338, %v127_v29 }
 0x1f8   :  { %v297_v31 = vsel %vm79_vm1, %v287_v30, -inf  ;;  %v257_v32 = vpop.f32.mrf.mxu1 }
 0x1f9   :  { %298 = vmax.xlane.f32.xlu0 %v297_v31  ;;  %v292_v33 = vmul.f32 0.35355338, %v257_v32 }
 0x1fb   :  { %v312_v36 = vsel %vm79_vm1, %v292_v33, -inf }
 0x1fd   :  { %v153_v34 = vpop.f32.mrf.mxu3  ;;  %v205_v41 = vpop.f32.mrf.mxu2 }
 0x1fe   :  { %v288_v35 = vmul.f32 0.35355338, %v153_v34  ;;  %v2129_v44 = vmul.f32 0.35355338, %v205_v41 }
 0x200   :  { %v300_v37 = vsel %vm79_vm1, %v288_v35, -inf  ;;  %v306_v45 = vsel %vm79_vm1, %v2129_v44, -inf }
 0x201   :  { %313 = vmax.xlane.f32.xlu0 %v312_v36  ;;  %301 = vmax.xlane.f32.xlu1 %v300_v37 }
 0x205   :  { %v231_v39 = vpop.f32.mrf.mxu3  ;;  %v283_v46 = vpop.f32.mrf.mxu2 }
 0x206   :  { %v291_v40 = vmul.f32 0.35355338, %v231_v39  ;;  %v293_v47 = vmul.f32 0.35355338, %v283_v46 }
 0x208   :  { %v309_v43 = vsel %vm79_vm1, %v291_v40, -inf  ;;  %v315_v48 = vsel %vm79_vm1, %v293_v47, -inf }
 0x209   :  { %295 = vmax.xlane.f32.xlu1 %v294_v42  ;;  %310 = vmax.xlane.f32.xlu2 %v309_v43 }
 0x211   :  { %307 = vmax.xlane.f32.xlu2 %v306_v45 }
 0x219   :  { %316 = vmax.xlane.f32.xlu2 %v315_v48 }
 0x231   :  { %1809 = vrot.lane.b32.xlu2 %v1808_v49, %s1974_s10 }
 0x266   :  { %v305_v50 = vpop.xlane.xlu2 %304 }
 0x267   :  { %v321_v51 = vsub.f32 %v289_v27, %v305_v50  ;;  %v1803_v27 = vpack.i.bf16 %v2076_v13, %v2074_v12  ;;  %v1813_v12 = vpack.i.bf16 %v2082_v14, %v2072_v11 }
 0x269   :  { %v332_v52 = vmul.f32 1.442695, %v321_v51 }
 0x26b   :  { %1866 = vpow2.f32 %v332_v52 }
 0x26c   :  { %v299_v53 = vpop.xlane.xlu0 %298 }
 0x26d   :  { %v319_v54 = vsub.f32 %v287_v30, %v299_v53 }
 0x26f   :  { %v328_v55 = vmul.f32 1.442695, %v319_v54 }
 0x271   :  { %v2137_v56 = vpop.eup %1866  ;;  %1868 = vpow2.f32 %v328_v55 }
 0x272   :  { %v351_v57 = vsel %vm79_vm1, %v2137_v56, 0.0 }
 0x273   :  { %352 = vadd.xlane.f32.xlu0 %v351_v57 }
 0x274   :  { %v302_v58 = vpop.xlane.xlu1 %301  ;;  %v314_v59 = vpop.xlane.xlu0 %313 }
 0x275   :  { %v320_v60 = vsub.f32 %v288_v35, %v302_v58  ;;  %v324_v61 = vsub.f32 %v292_v33, %v314_v59 }
 0x277   :  { %v2141_v62 = vpop.eup %1868  ;;  %v330_v63 = vmul.f32 1.442695, %v320_v60  ;;  %v338_v6 = vmul.f32 1.442695, %v324_v61 }
 0x278   :  { %v345_v7 = vsel %vm79_vm1, %v2141_v62, 0.0 }
 0x279   :  { %1870 = vpow2.f32 %v330_v63  ;;  %346 = vadd.xlane.f32.xlu1 %v345_v7 }
 0x27a   :  { %1872 = vpow2.f32 %v338_v6 }
 0x27c   :  { %v311_v9 = vpop.xlane.xlu2 %310  ;;  %v296_v32 = vpop.xlane.xlu1 %295 }
 0x27d   :  { %v323_v15 = vsub.f32 %v291_v40, %v311_v9  ;;  %v318_v33 = vsub.f32 %v2124_v38, %v296_v32 }
 0x27f   :  { %v1871_v16 = vpop.eup %1870  ;;  %v336_v17 = vmul.f32 1.442695, %v323_v15  ;;  %v326_v13 = vmul.f32 1.442695, %v318_v33 }
 0x280   :  { %v2145_v18 = vpop.eup %1872  ;;  %v348_v19 = vsel %vm79_vm1, %v1871_v16, 0.0 }
 0x281   :  { %349 = vadd.xlane.f32.xlu2 %v348_v19  ;;  %v360_v20 = vsel %vm79_vm1, %v2145_v18, 0.0  ;;  %1874 = vpow2.f32 %v336_v17  ;;  %v1818_v17 = vpack.i.bf16 %v2019_v1, %v2014_v0 }
 0x282   :  { %361 = vadd.xlane.f32.xlu0 %v360_v20 }
 0x284   :  { %v308_v21 = vpop.xlane.xlu2 %307 }
 0x285   :  { %v322_v36 = vsub.f32 %v2129_v44, %v308_v21 }
 0x287   :  { %v2150_v22 = vpop.eup %1874 }
 0x288   :  { %v357_v23 = vsel %vm79_vm1, %v2150_v22, 0.0 }
 0x289   :  { %358 = vadd.xlane.f32.xlu2 %v357_v23 }
 0x28c   :  { %v317_v24 = vpop.xlane.xlu2 %316 }
 0x28d   :  { %v325_v25 = vsub.f32 %v293_v47, %v317_v24 }
 0x28f   :  { %v340_v26 = vmul.f32 1.442695, %v325_v25 }
 0x291   :  { %1876 = vpow2.f32 %v340_v26 }
 0x292   :  { %1804 = vrot.lane.b32.xlu1 %v1803_v27, %s1974_s10  ;;  %1878 = vpow2.f32 %v326_v13 }
 0x294   :  { %v1810_v28 = vpop.permute.xlu2 %1809 }
 0x295   :  { %v1811_v29 = vunpack.i.l.bf16 %v1810_v28  ;;  %v1812_v51 = vunpack.i.h.bf16 %v1810_v28  ;;  %v1859_v28 = vld [vmem:[%s2543_s4] ss:$0 sm:$0xff] }
 0x297   :  { %v1877_v30 = vpop.eup %1876  ;;  %455 = vmatpush.msrb.mxu1 %v1811_v29 }
 0x298   :  { %v363_v31 = vsel %vm79_vm1, %v1877_v30, 0.0  ;;  %v1879_v34 = vpop.eup %1878 }
 0x299   :  { %364 = vadd.xlane.f32.xlu0 %v363_v31  ;;  %v342_v35 = vsel %vm79_vm1, %v1879_v34, 0.0 }
 0x2a1   :  { %382 = vrot.lane.b32.xlu2 %v2052_v8, %s1974_s10  ;;  %v334_v8 = vmul.f32 1.442695, %v322_v36 }
 0x2a3   :  { %1880 = vpow2.f32 %v334_v8 }
 0x2a9   :  { %486 = vrot.lane.b32.xlu2 %v2058_v10, %s1974_s10  ;;  %v1881_v37 = vpop.eup %1880 }
 0x2aa   :  { %v354_v38 = vsel %vm79_vm1, %v1881_v37, 0.0 }
 0x2ad   :  { %1814 = vrot.lane.b32.xlu0 %v1813_v12, %s1974_s10 }
 0x2b1   :  { %1819 = vrot.lane.b32.xlu2 %v1818_v17, %s1975_s11 }
 0x2bc   :  { %343 = vadd.xlane.f32.xlu1 %v342_v35 }
 0x2d7   :  { %355 = vadd.xlane.f32.xlu0 %v354_v38 }
 0x2e6   :  { %v353_v39 = vpop.xlane.xlu0 %352 }
 0x2ec   :  { %v347_v11 = vpop.xlane.xlu1 %346 }
 0x2f4   :  { %v350_v10 = vpop.xlane.xlu2 %349 }
 0x2f5   :  { %1882 = vrcp.f32 %v350_v10  ;;  %v362_v44 = vpop.xlane.xlu0 %361 }
 0x2f6   :  { %1884 = vrcp.f32 %v353_v39 }
 0x2f7   :  { %1886 = vrcp.f32 %v347_v11 }
 0x2fb   :  { %v1883_v14 = vpop.eup %1882 }
 0x2fc   :  { %v376_v40 = vmul.f32 %v1883_v14, %v1871_v16  ;;  %v359_v41 = vpop.xlane.xlu2 %358  ;;  %v1885_v42 = vpop.eup %1884 }
 0x2fd   :  { %v1887_v43 = vpop.eup %1886  ;;  %v377_v49 = vmul.f32 %v1885_v42, %v2137_v56 }
 0x2fe   :  { %1752 = vmatmul.msk.f32.vlgmr.msrb.gmra.mxu1 %vm79_vm1, %v376_v40  ;;  %v375_v50 = vmul.f32 %v1887_v43, %v2141_v62 }
 0x304   :  { %v1805_v45 = vpop.permute.xlu1 %1804  ;;  %v383_v46 = vpop.permute.xlu2 %382 }
 0x305   :  { %v1806_v47 = vunpack.i.l.bf16 %v1805_v45  ;;  %v1807_v48 = vunpack.i.h.bf16 %v1805_v45  ;;  %403 = vmatpush.msra.mxu3 %v383_v46  ;;  %v1979_v45 = vmov 32.0   ;;  %v745_v46 = vld [vmem:[%s2541_s2 + $0x38] sm:$0xff] }
 0x307   :  { %429 = vmatpush.msrb.mxu0 %v1807_v48  ;;  %481 = vmatpush.msrb.mxu2 %v1806_v47 }
 0x308   :  { %1751 = vmatmul.msk.f32.vlgmr.msrb.gmra.mxu0 %vm79_vm1, %v375_v50  ;;  %1753 = vmatmul.msk.f32.vlgmr.msrb.gmra.mxu2 %vm79_vm1, %v377_v49 }
 0x309   :  { %585 = vmatpush.msra.mxu2 %v1812_v51  ;;  %v744_v51 = vld [vmem:[%s2541_s2 + $0x20] sm:$0xff] }
 0x30c   :  { %v365_v52 = vpop.xlane.xlu0 %364  ;;  %v487_v53 = vpop.permute.xlu2 %486 }
 0x30d   :  { %1888 = vrcp.f32 %v365_v52  ;;  %507 = vmatpush.msrb.mxu3 %v487_v53  ;;  %v743_v52 = vld [vmem:[%s2541_s2 + $0x8] sm:$0xff] }
 0x30e   :  { %1890 = vrcp.f32 %v362_v44 }
 0x30f   :  { %1892 = vrcp.f32 %v359_v41 }
 0x313   :  { %v1889_v54 = vpop.eup %1888 }
 0x314   :  { %v381_v55 = vmul.f32 %v1889_v54, %v1877_v30  ;;  %v1891_v56 = vpop.eup %1890 }
 0x315   :  { %v1893_v57 = vpop.eup %1892  ;;  %v380_v61 = vmul.f32 %v1891_v56, %v2145_v18  ;;  %v1823_v18 = vpack.i.bf16 %v2030_v3, %v2025_v2  ;;  %v1820_v3 = vpop.permute.xlu2 %1819  ;;  %v1860_v56 = vld [vmem:[%s2543_s4 + $0x3] ss:$0 sm:$0xff] }
 0x316   :  { %1757 = vmatmul.msk.f32.vlgmr.msra.gmra.mxu2 %vm79_vm1, %v381_v55  ;;  %v379_v62 = vmul.f32 %v1893_v57, %v2150_v22  ;;  %v1822_v22 = vunpack.i.h.bf16 %v1820_v3  ;;  %v1821_v23 = vunpack.i.l.bf16 %v1820_v3 }
 0x317   :  { %1824 = vrot.lane.b32.xlu1 %v1823_v18, %s1975_s11  ;;  %v2243_v18 = vld [vmem:[%s2543_s4 + $0x1] ss:$0 sm:$0xff] }
 0x31f   :  { %v1815_v58 = vpop.permute.xlu0 %1814 }
 0x320   :  { %v1817_v59 = vunpack.i.h.bf16 %v1815_v58  ;;  %v1816_v60 = vunpack.i.l.bf16 %v1815_v58 }
 0x322   :  { %533 = vmatpush.msra.mxu0 %v1816_v60  ;;  %559 = vmatpush.msra.mxu1 %v1817_v59 }
 0x323   :  { %1755 = vmatmul.msk.f32.vlgmr.msra.gmra.mxu0 %vm79_vm1, %v379_v62  ;;  %1756 = vmatmul.msk.f32.vlgmr.msra.gmra.mxu1 %vm79_vm1, %v380_v61 }
 0x324   :  { %666 = vmatpush.msrb.mxu0 %v1821_v23 }
 0x326   :  { %667 = vmatpush.msrb.mxu0 %v1822_v22  ;;  %v23_v22 = vld [vmem:[%s2540_s1] sm:$0xff] }
 0x32f   :  { %v344_v63 = vpop.xlane.xlu1 %343 }
 0x330   :  { %1894 = vrcp.f32 %v344_v63 }
 0x336   :  { %v1895_v6 = vpop.eup %1894 }
 0x337   :  { %v374_v7 = vmul.f32 %v1895_v6, %v1879_v34 }
 0x339   :  { %1750 = vmatmul.msk.f32.vlgmr.msra.gmra.mxu3 %vm79_vm1, %v374_v7 }
 0x34a   :  { %v356_v9 = vpop.xlane.xlu0 %355 }
 0x34b   :  { %1896 = vrcp.f32 %v356_v9  ;;  %v2235_v9 = vpack.i.bf16 %v743_v52, %v744_v51 }
 0x34c   :  { %1898 = vrcp.f32 %v1979_v45 }
 0x351   :  { %v1897_v15 = vpop.eup %1896 }
 0x352   :  { %v378_v16 = vmul.f32 %v1897_v15, %v1881_v37  ;;  %v1899_v48 = vpop.eup %1898 }
 0x353   :  { %vm691_vm4 = vweird.f32 %v1899_v48 }
 0x354   :  { %1754 = vmatmul.msk.f32.vlgmr.msrb.gmra.mxu3 %vm79_vm1, %v378_v16 }
 0x37b   :  { %v457_v21 = vpop.f32.mrf.mxu1 }
 0x385   :  { %v431_v19 = vpop.f32.mrf.mxu0 }
 0x386   :  { %591 = vrot.lane.b32.xlu2 %v431_v19, %s1976_s12 }
 0x389   :  { %v1825_v24 = vpop.permute.xlu1 %1824 }
 0x38a   :  { %v1827_v25 = vunpack.i.h.bf16 %v1825_v24  ;;  %v1826_v26 = vunpack.i.l.bf16 %v1825_v24 }
 0x38b   :  { %v483_v20 = vpop.f32.mrf.mxu2 }
 0x38c   :  { %599 = vrot.lane.b32.xlu0 %v483_v20, %s1977_s13  ;;  %668 = vmatpush.msrb.mxu0 %v1826_v26 }
 0x38e   :  { %595 = vrot.lane.b32.xlu2 %v457_v21, %s1978_s14  ;;  %669 = vmatpush.msrb.mxu0 %v1827_v25 }
 0x399   :  { %v587_v0 = vpop.f32.mrf.mxu2 }
 0x39a   :  { %616 = vrot.lane.b32.xlu1 %v587_v0, %s1977_s13 }
 0x3a0   :  { %v535_v1 = vpop.f32.mrf.mxu0  ;;  %v561_v2 = vpop.f32.mrf.mxu1 }
 0x3a1   :  { %608 = vrot.lane.b32.xlu2 %v535_v1, %s1976_s12 }
 0x3a9   :  { %612 = vrot.lane.b32.xlu2 %v561_v2, %s1978_s14 }
 0x3b1   :  { %645 = vrot.lane.b32.xlu2 %v1859_v28, %s1975_s11 }
 0x3bc   :  { %v405_v30 = vpop.f32.mrf.mxu3 }
 0x3d7   :  { %v509_v35 = vpop.f32.mrf.mxu3 }
 0x3e0   :  { %v592_v27 = vpop.permute.xlu2 %591 }
 0x3e1   :  { %v602_v31 = vsel %vm79_vm1, %v405_v30, %v592_v27 }
 0x3e8   :  { %v596_v29 = vpop.permute.xlu2 %595 }
 0x3e9   :  { %v604_v32 = vsel %vm603_vm2, %v602_v31, %v596_v29  ;;  %v24_v29 = vld [vmem:[%s2540_s1 + $0x8] sm:$0xff] }
 0x3fb   :  { %v609_v12 = vpop.permute.xlu2 %608 }
 0x3fc   :  { %v619_v36 = vsel %vm79_vm1, %v509_v35, %v609_v12 }
 0x3fe   :  { %v600_v33 = vpop.permute.xlu0 %599 }
 0x3ff   :  { %v606_v13 = vsel %vm605_vm3, %v604_v32, %v600_v33 }
 0x400   :  { %1758 = vmatmul.msk.f32.vlgmr.msrb.gmra.mxu0 %vm33_vm0, %v606_v13 }
 0x403   :  { %v613_v34 = vpop.permute.xlu2 %612 }
 0x404   :  { %v620_v8 = vsel %vm603_vm2, %v619_v36, %v613_v34 }
 0x40b   :  { %v646_v10 = vpop.permute.xlu2 %645 }
 0x40c   :  { %v617_v37 = vpop.permute.xlu1 %616 }
 0x40d   :  { %v621_v38 = vsel %vm605_vm3, %v620_v8, %v617_v37 }
 0x40e   :  { %1759 = vmatmul.msk.f32.gmra.mxu0 %vm33_vm0, %v621_v38 }
 0x47d   :  { %v671_v39 = vpop.f32.mrf.mxu0 }
 0x47e   :  { %v672_v11 = vadd.f32 %v671_v39, %v646_v10 }
 0x480   :  { %v677_v14 = vadd.f32 %v672_v11, %v2037_v4  ;;  %v746_v4 = vld [vmem:[%s2541_s2 + $0x50] sm:$0xff] }
 0x481   :  { %v2215_v47 = vpack.i.bf16 %v745_v46, %v746_v4  ;;  %769 = vmatpush.msra.mxu0 %v746_v4 }
 0x482   :  { %v680_v40 = vsel %vm33_vm0, %v677_v14, 0.0 }
 0x483   :  { %681 = vadd.xlane.f32.xlu0 %v680_v40  ;;  %770 = vmatpush.msra.mxu0 %v745_v46 }
 0x485   :  { %771 = vmatpush.msra.mxu0 %v744_v51 }
 0x487   :  { %772 = vmatpush.msra.mxu0 %v743_v52 }
 0x48b   :  { %v674_v41 = vpop.f32.mrf.mxu0 }
 0x48c   :  { %v675_v42 = vadd.f32 %v674_v41, %v646_v10 }
 0x48e   :  { %v678_v43 = vadd.f32 %v675_v42, %v2045_v5  ;;  %v687_v5 = vmul.f32 32.0, %v1899_v48 }
 0x490   :  { %v683_v44 = vsel %vm33_vm0, %v678_v43, 0.0  ;;  %v688_v49 = vsub.f32 1.0, %v687_v5 }
 0x491   :  { %684 = vadd.xlane.f32.xlu1 %v683_v44 }
 0x492   :  { %v689_v50 = vmul.f32 %v1899_v48, %v688_v49 }
 0x494   :  { %v690_v53 = vadd.f32 %v1899_v48, %v689_v50 }
 0x496   :  { %v2225_v54 = vsel %vm691_vm4, %v1899_v48, %v690_v53 }
 0x4aa   :  { %1829 = vrot.lane.b32.xlu1 %v2215_v47, %s1973_s9 }
 0x4b2   :  { %738 = vrot.lane.b32.xlu1 %v1860_v56, %s1974_s10 }
 0x4f6   :  { %v682_v55 = vpop.xlane.xlu0 %681 }
 0x4f7   :  { %v693_v57 = vmul.f32 %v2225_v54, %v682_v55 }
 0x4f9   :  { %v695_v58 = vsub.f32 %v677_v14, %v693_v57 }
 0x4fb   :  { %v697_v59 = vmul.f32 %v695_v58, %v695_v58 }
 0x4fd   :  { %v699_v60 = vsel %vm33_vm0, %v697_v59, 0.0 }
 0x4fe   :  { %700 = vadd.xlane.f32.xlu2 %v699_v60 }
 0x504   :  { %v685_v61 = vpop.xlane.xlu1 %684 }
 0x505   :  { %v694_v62 = vmul.f32 %v2225_v54, %v685_v61 }
 0x507   :  { %v696_v63 = vsub.f32 %v678_v43, %v694_v62 }
 0x509   :  { %v698_v6 = vmul.f32 %v696_v63, %v696_v63 }
 0x50b   :  { %v702_v7 = vsel %vm33_vm0, %v698_v6, 0.0 }
 0x50c   :  { %703 = vadd.xlane.f32.xlu0 %v702_v7 }
 0x516   :  { %1834 = vrot.lane.b32.xlu2 %v2235_v9, %s1973_s9 }
 0x51c   :  { %v1830_v15 = vpop.permute.xlu1 %1829 }
 0x51d   :  { %v1831_v16 = vunpack.i.l.bf16 %v1830_v15  ;;  %v1832_v17 = vunpack.i.h.bf16 %v1830_v15 }
 0x51f   :  { %817 = vmatpush.msrb.mxu1 %v1831_v16 }
 0x520   :  { %733 = vrot.lane.b32.xlu0 %v1860_v56, %s1973_s9 }
 0x521   :  { %818 = vmatpush.msrb.mxu1 %v1832_v17 }
 0x524   :  { %v739_v37 = vpop.permute.xlu1 %738 }
 0x528   :  { %796 = vrot.lane.b32.xlu0 %v2243_v18, %s1973_s9 }
 0x571   :  { %v701_v19 = vpop.xlane.xlu2 %700 }
 0x572   :  { %v705_v20 = vmul.f32 %v701_v19, %v2225_v54 }
 0x574   :  { %v707_v21 = vadd.f32 1e-05, %v705_v20 }
 0x576   :  { %1900 = vrsqrt.f32 %v707_v21  ;;  %vm715_vm6 = vweird.f32 %v707_v21 }
 0x579   :  { %v1835_v0 = vpop.permute.xlu2 %1834 }
 0x57a   :  { %v1837_v1 = vunpack.i.h.bf16 %v1835_v0  ;;  %v1836_v2 = vunpack.i.l.bf16 %v1835_v0 }
 0x57c   :  { %v1901_v3 = vpop.eup %1900  ;;  %819 = vmatpush.msrb.mxu1 %v1836_v2 }
 0x57d   :  { %v710_v23 = vmul.f32 %v1901_v3, %v707_v21  ;;  %vm716_vm5 = vweird.f32 %v1901_v3 }
 0x57e   :  { %820 = vmatpush.msrb.mxu1 %v1837_v1  ;;  %vm717_vm7 = vmor %vm715_vm6, %vm716_vm5 }
 0x57f   :  { %v711_v24 = vmul.f32 %v1901_v3, %v710_v23  ;;  %1762 = vmatmul.msk.f32.vlgmr.msrb.gmra.mxu1 %vm33_vm0, %v23_v22  ;;  %v704_v25 = vpop.xlane.xlu0 %703 }
 0x580   :  { %v706_v26 = vmul.f32 %v704_v25, %v2225_v54 }
 0x581   :  { %v712_v27 = vmul.f32 0.5, %v711_v24 }
 0x582   :  { %v708_v28 = vadd.f32 1e-05, %v706_v26 }
 0x583   :  { %v713_v30 = vsub.f32 1.5, %v712_v27 }
 0x584   :  { %1902 = vrsqrt.f32 %v708_v28  ;;  %vm725_vm9 = vweird.f32 %v708_v28 }
 0x585   :  { %v714_v32 = vmul.f32 %v1901_v3, %v713_v30 }
 0x587   :  { %1763 = vmatmul.msk.f32.gmra.mxu1 %vm33_vm0, %v24_v29  ;;  %v718_v13 = vsel %vm717_vm7, %v1901_v3, %v714_v32 }
 0x588   :  { %v729_v36 = vmul.f32 %v718_v13, %v695_v58 }
 0x58a   :  { %v1903_v31 = vpop.eup %1902 }
 0x58b   :  { %v720_v33 = vmul.f32 %v1903_v31, %v708_v28  ;;  %vm726_vm8 = vweird.f32 %v1903_v31 }
 0x58c   :  { %vm727_vm10 = vmor %vm725_vm9, %vm726_vm8  ;;  %vm1660_vm8 = vcmask 523264   ;;  %vm1662_vm9 = vcmask 785408  }
 0x58d   :  { %v721_v12 = vmul.f32 %v1903_v31, %v720_v33 }
 0x58f   :  { %v722_v34 = vmul.f32 0.5, %v721_v12 }
 0x591   :  { %v723_v35 = vsub.f32 1.5, %v722_v34 }
 0x592   :  { %v734_v8 = vpop.permute.xlu0 %733 }
 0x593   :  { %v724_v38 = vmul.f32 %v1903_v31, %v723_v35  ;;  %v736_v10 = vmul.f32 %v734_v8, %v729_v36 }
 0x595   :  { %v728_v39 = vsel %vm727_vm10, %v1903_v31, %v724_v38  ;;  %v2257_v11 = vadd.f32 %v739_v37, %v736_v10  ;;  %vm1706_vm10 = vcmask 1040384  }
 0x596   :  { %v730_v14 = vmul.f32 %v728_v39, %v696_v63 }
 0x597   :  { %1760 = vmatmul.msk.f32.vlgmr.msra.gmra.mxu0 %vm33_vm0, %v2257_v11 }
 0x598   :  { %v737_v40 = vmul.f32 %v734_v8, %v730_v14 }
 0x59a   :  { %v2261_v41 = vadd.f32 %v739_v37, %v737_v40  ;;  %v797_v42 = vpop.permute.xlu0 %796 }
 0x59f   :  { %1761 = vmatmul.msk.f32.gmra.mxu0 %vm33_vm0, %v2261_v41 }
 0x5fc   :  { %v822_v43 = vpop.f32.mrf.mxu1 }
 0x5fd   :  { %v2265_v44 = vadd.f32 %v822_v43, %v797_v42 }
 0x5ff   :  { %845 = vrot.lane.b32.xlu1 %v2265_v44, %s1972_s0  ;;  %843 = vrot.lane.b32.xlu2 %v2265_v44, %s1971_s8 }
 0x600   :  { %1764 = vmatpush.xpose.msk.msrb.mxu2 %vm79_vm1, %v2265_v44 }
 0x604   :  { %v825_v45 = vpop.f32.mrf.mxu1 }
 0x605   :  { %v2273_v46 = vadd.f32 %v825_v45, %v797_v42 }
 0x607   :  { %850 = vrot.lane.b32.xlu1 %v2273_v46, %s1971_s8  ;;  %1772 = vmatpush.xpose.msk.msra.mxu1 %vm79_vm1, %v2273_v46 }
 0x614   :  { %v774_v4 = vpop.f32.mrf.mxu0 }
 0x615   :  { %v775_v48 = vadd.f32 %v2243_v18, %v774_v4 }
 0x617   :  { %829 = vrot.lane.b32.xlu0 %v775_v48, %s1971_s8  ;;  %831 = vrot.lane.b32.xlu2 %v775_v48, %s1972_s0 }
 0x618   :  { %1765 = vmatmul.msk.f32.vlgmr.msrb.gmra.mxu2 %vm79_vm1, %v775_v48 }
 0x61c   :  { %v777_v5 = vpop.f32.mrf.mxu0 }
 0x61d   :  { %v778_v49 = vadd.f32 %v2243_v18, %v777_v5 }
 0x61f   :  { %852 = vrot.lane.b32.xlu0 %v2273_v46, %s1972_s0  ;;  %1773 = vmatmul.msk.f32.vlgmr.msra.gmra.mxu1 %vm79_vm1, %v778_v49 }
 0x620   :  { %838 = vrot.lane.b32.xlu1 %v778_v49, %s1972_s0  ;;  %836 = vrot.lane.b32.xlu2 %v778_v49, %s1971_s8 }
 0x627   :  { %847 = vrot.lane.b32.xlu0 %v2265_v44, %s1970_s7 }
 0x628   :  { %854 = vrot.lane.b32.xlu1 %v2273_v46, %s1970_s7  ;;  %833 = vrot.lane.b32.xlu2 %v775_v48, %s1970_s7 }
 0x62f   :  { %840 = vrot.lane.b32.xlu0 %v778_v49, %s1970_s7 }
 0x659   :  { %v2295_v50 = vpop.permute.xlu2 %843 }
 0x65a   :  { %1766 = vmatpush.xpose.msk.msra.mxu2 %vm79_vm1, %v2295_v50 }
 0x671   :  { %v2299_v51 = vpop.permute.xlu1 %845  ;;  %v832_v53 = vpop.permute.xlu2 %831 }
 0x672   :  { %v1838_v52 = vpack.i.bf16 %v2299_v51, %v2295_v50  ;;  %1768 = vmatpush.xpose.msk.msra.mxu3 %vm79_vm1, %v2299_v51 }
 0x675   :  { %1769 = vmatmul.msk.f32.vlgmr.msra.gmra.mxu3 %vm79_vm1, %v832_v53 }
 0x679   :  { %v851_v55 = vpop.permute.xlu1 %850 }
 0x67a   :  { %1774 = vmatpush.xpose.msk.msrb.mxu2 %vm79_vm1, %v851_v55  ;;  %v837_v57 = vpop.permute.xlu2 %836 }
 0x682   :  { %v834_v6 = vpop.permute.xlu2 %833 }
 0x689   :  { %v830_v56 = vpop.permute.xlu0 %829 }
 0x68a   :  { %1767 = vmatmul.msk.f32.vlgmr.msra.gmra.mxu2 %vm79_vm1, %v830_v56 }
 0x691   :  { %v2308_v58 = vpop.permute.xlu0 %852 }
 0x692   :  { %v839_v59 = vpop.permute.xlu1 %838  ;;  %1775 = vmatmul.msk.f32.vlgmr.msrb.gmra.mxu2 %vm79_vm1, %v837_v57  ;;  %1776 = vmatpush.xpose.msk.msrb.mxu3 %vm79_vm1, %v2308_v58 }
 0x695   :  { %1777 = vmatmul.msk.f32.vlgmr.msrb.gmra.mxu3 %vm79_vm1, %v839_v59 }
 0x699   :  { %v848_v60 = vpop.permute.xlu0 %847 }
 0x69a   :  { %v2314_v61 = vpop.permute.xlu1 %854  ;;  %v1843_v62 = vpack.i.bf16 %v851_v55, %v848_v60  ;;  %1770 = vmatpush.xpose.msk.msrb.mxu0 %vm79_vm1, %v848_v60 }
 0x69b   :  { %v877_v63 = vpop.f32.mrf.mxu2 }
 0x69c   :  { %v2319_v7 = vmul.f32 0.35355338, %v877_v63  ;;  %v973_v31 = vpop.f32.mrf.mxu1 }
 0x69d   :  { %1771 = vmatmul.msk.f32.vlgmr.msrb.gmra.mxu0 %vm79_vm1, %v834_v6  ;;  %v1052_v32 = vmul.f32 0.35355338, %v973_v31 }
 0x69e   :  { %1778 = vmatpush.xpose.msk.msra.mxu0 %vm79_vm1, %v2314_v61  ;;  %v1056_v15 = vsel %vm79_vm1, %v2319_v7, -inf }
 0x69f   :  { %1057 = vmax.xlane.f32.xlu0 %v1056_v15  ;;  %v1068_v33 = vsel %vm79_vm1, %v1052_v32, -inf }
 0x6a1   :  { %v841_v16 = vpop.permute.xlu0 %840 }
 0x6a5   :  { %1779 = vmatmul.msk.f32.vlgmr.msra.gmra.mxu0 %vm79_vm1, %v841_v16 }
 0x6f8   :  { %v925_v17 = vpop.f32.mrf.mxu3 }
 0x6f9   :  { %v1050_v18 = vmul.f32 0.35355338, %v925_v17 }
 0x6fb   :  { %v1062_v19 = vsel %vm79_vm1, %v1050_v18, -inf }
 0x6fc   :  { %1063 = vmax.xlane.f32.xlu1 %v1062_v19 }
 0x70d   :  { %v901_v20 = vpop.f32.mrf.mxu2 }
 0x70e   :  { %v1049_v21 = vmul.f32 0.35355338, %v901_v20 }
 0x710   :  { %v1059_v0 = vsel %vm79_vm1, %v1049_v21, -inf }
 0x711   :  { %1060 = vmax.xlane.f32.xlu2 %v1059_v0 }
 0x712   :  { %v1058_v8 = vpop.xlane.xlu0 %1057 }
 0x715   :  { %v997_v28 = vpop.f32.mrf.mxu2 }
 0x716   :  { %v1053_v29 = vmul.f32 0.35355338, %v997_v28 }
 0x718   :  { %v1021_v1 = vpop.f32.mrf.mxu3  ;;  %v1071_v30 = vsel %vm79_vm1, %v1053_v29, -inf }
 0x719   :  { %v1054_v2 = vmul.f32 0.35355338, %v1021_v1 }
 0x71a   :  { %v949_v3 = vpop.f32.mrf.mxu0 }
 0x71b   :  { %v1051_v22 = vmul.f32 0.35355338, %v949_v3  ;;  %v1074_v23 = vsel %vm79_vm1, %v1054_v2, -inf }
 0x71c   :  { %1075 = vmax.xlane.f32.xlu1 %v1074_v23 }
 0x71d   :  { %v1065_v24 = vsel %vm79_vm1, %v1051_v22, -inf }
 0x71e   :  { %1066 = vmax.xlane.f32.xlu0 %v1065_v24 }
 0x722   :  { %v1045_v25 = vpop.f32.mrf.mxu0 }
 0x723   :  { %v1055_v26 = vmul.f32 0.35355338, %v1045_v25 }
 0x725   :  { %v1077_v27 = vsel %vm79_vm1, %v1055_v26, -inf }
 0x726   :  { %1078 = vmax.xlane.f32.xlu2 %v1077_v27 }
 0x72e   :  { %1072 = vmax.xlane.f32.xlu2 %v1071_v30 }
 0x732   :  { %1844 = vrot.lane.b32.xlu0 %v1843_v62, %s1973_s9 }
 0x736   :  { %1069 = vmax.xlane.f32.xlu2 %v1068_v33 }
 0x76f   :  { %v1064_v12 = vpop.xlane.xlu1 %1063 }
 0x770   :  { %v1082_v13 = vsub.f32 %v1050_v18, %v1064_v12 }
 0x772   :  { %v1092_v34 = vmul.f32 1.442695, %v1082_v13 }
 0x774   :  { %1904 = vpow2.f32 %v1092_v34 }
 0x77a   :  { %v2333_v35 = vpop.eup %1904 }
 0x77b   :  { %v1110_v36 = vsel %vm79_vm1, %v2333_v35, 0.0 }
 0x77c   :  { %1111 = vadd.xlane.f32.xlu0 %v1110_v36 }
 0x784   :  { %v1061_v10 = vpop.xlane.xlu2 %1060 }
 0x785   :  { %v1081_v42 = vsub.f32 %v1049_v21, %v1061_v10 }
 0x787   :  { %v1090_v45 = vmul.f32 1.442695, %v1081_v42 }
 0x78f   :  { %v1076_v37 = vpop.xlane.xlu1 %1075 }
 0x790   :  { %v1086_v38 = vsub.f32 %v1054_v2, %v1076_v37 }
 0x791   :  { %v1067_v39 = vpop.xlane.xlu0 %1066 }
 0x792   :  { %v1100_v14 = vmul.f32 1.442695, %v1086_v38  ;;  %v1083_v40 = vsub.f32 %v1051_v22, %v1067_v39 }
 0x794   :  { %1906 = vpow2.f32 %v1100_v14  ;;  %v1094_v43 = vmul.f32 1.442695, %v1083_v40 }
 0x796   :  { %1908 = vpow2.f32 %v1094_v43 }
 0x797   :  { %1910 = vpow2.f32 %v1090_v45 }
 0x799   :  { %v1079_v4 = vpop.xlane.xlu2 %1078 }
 0x79a   :  { %v2337_v48 = vpop.eup %1906  ;;  %v1087_v5 = vsub.f32 %v1055_v26, %v1079_v4 }
 0x79b   :  { %v1122_v49 = vsel %vm79_vm1, %v2337_v48, 0.0 }
 0x79c   :  { %v1909_v53 = vpop.eup %1908  ;;  %v1102_v55 = vmul.f32 1.442695, %v1087_v5  ;;  %1123 = vadd.xlane.f32.xlu0 %v1122_v49 }
 0x79d   :  { %v1113_v56 = vsel %vm79_vm1, %v1909_v53, 0.0  ;;  %v2342_v59 = vpop.eup %1910 }
 0x79e   :  { %1912 = vpow2.f32 %v1102_v55  ;;  %1114 = vadd.xlane.f32.xlu1 %v1113_v56  ;;  %v1107_v17 = vsel %vm79_vm1, %v2342_v59, 0.0 }
 0x7a1   :  { %v1073_v57 = vpop.xlane.xlu2 %1072 }
 0x7a2   :  { %v1085_v60 = vsub.f32 %v1053_v29, %v1073_v57 }
 0x7a4   :  { %v1913_v62 = vpop.eup %1912  ;;  %v1098_v63 = vmul.f32 1.442695, %v1085_v60  ;;  %v2344_v6 = vpop.permute.xlu0 %1844 }
 0x7a5   :  { %v1846_v15 = vunpack.i.l.bf16 %v2344_v6  ;;  %v1125_v16 = vsel %vm79_vm1, %v1913_v62, 0.0  ;;  %v1847_v13 = vunpack.i.h.bf16 %v2344_v6 }
 0x7a6   :  { %1914 = vpow2.f32 %v1098_v63  ;;  %1126 = vadd.xlane.f32.xlu2 %v1125_v16  ;;  %1108 = vadd.xlane.f32.xlu1 %v1107_v17  ;;  %v1862_v63 = vld [vmem:[%s2543_s4 + $0x1] ss:$0 sm:$0xff] }
 0x7a7   :  { %1243 = vmatpush.msrb.mxu0 %v1846_v15 }
 0x7a9   :  { %v1070_v20 = vpop.xlane.xlu2 %1069 }
 0x7aa   :  { %v1084_v21 = vsub.f32 %v1052_v32, %v1070_v20 }
 0x7ac   :  { %v2350_v18 = vpop.eup %1914  ;;  %v1096_v0 = vmul.f32 1.442695, %v1084_v21 }
 0x7ad   :  { %v1119_v19 = vsel %vm79_vm1, %v2350_v18, 0.0 }
 0x7ae   :  { %1120 = vadd.xlane.f32.xlu2 %v1119_v19  ;;  %1916 = vpow2.f32 %v1096_v0 }
 0x7b0   :  { %1326 = vrot.lane.b32.xlu0 %v2314_v61, %s1973_s9  ;;  %v1080_v61 = vsub.f32 %v2319_v7, %v1058_v8 }
 0x7b2   :  { %v1088_v51 = vmul.f32 1.442695, %v1080_v61 }
 0x7b4   :  { %v2364_v1 = vpop.eup %1916  ;;  %1918 = vpow2.f32 %v1088_v51 }
 0x7b5   :  { %v1116_v50 = vsel %vm79_vm1, %v2364_v1, 0.0 }
 0x7bf   :  { %1839 = vrot.lane.b32.xlu1 %v1838_v52, %s1973_s9  ;;  %v1919_v52 = vpop.eup %1918 }
 0x7c6   :  { %1300 = vrot.lane.b32.xlu2 %v2308_v58, %s1973_s9 }
 0x7ce   :  { %1144 = vrot.lane.b32.xlu2 %v2265_v44, %s1973_s9  ;;  %v1104_v44 = vsel %vm79_vm1, %v1919_v52, 0.0 }
 0x7d6   :  { %1248 = vrot.lane.b32.xlu2 %v2273_v46, %s1973_s9 }
 0x7da   :  { %1117 = vadd.xlane.f32.xlu0 %v1116_v50 }
 0x7de   :  { %1849 = vrot.lane.b32.xlu2 %v2215_v47, %s1975_s11 }
 0x7e6   :  { %1854 = vrot.lane.b32.xlu2 %v2235_v9, %s1975_s11 }
 0x7e9   :  { %1105 = vadd.xlane.f32.xlu1 %v1104_v44 }
 0x7ef   :  { %v1112_v46 = vpop.xlane.xlu0 %1111 }
 0x80f   :  { %v1124_v22 = vpop.xlane.xlu0 %1123 }
 0x811   :  { %v1115_v58 = vpop.xlane.xlu1 %1114 }
 0x812   :  { %1920 = vrcp.f32 %v1115_v58 }
 0x818   :  { %v1921_v7 = vpop.eup %1920 }
 0x819   :  { %v1139_v2 = vmul.f32 %v1921_v7, %v1909_v53  ;;  %v1127_v3 = vpop.xlane.xlu2 %1126  ;;  %v1109_v9 = vpop.xlane.xlu1 %1108 }
 0x81a   :  { %1922 = vrcp.f32 %v1127_v3 }
 0x81b   :  { %1783 = vmatmul.msk.f32.vlgmr.msrb.gmra.mxu0 %vm79_vm1, %v1139_v2  ;;  %1924 = vrcp.f32 %v1112_v46 }
 0x81c   :  { %1926 = vrcp.f32 %v1109_v9 }
 0x81d   :  { %1928 = vrcp.f32 %v1124_v22 }
 0x820   :  { %v1923_v23 = vpop.eup %1922 }
 0x821   :  { %v1143_v47 = vmul.f32 %v1923_v23, %v1913_v62  ;;  %v1121_v24 = vpop.xlane.xlu2 %1120  ;;  %v1925_v27 = vpop.eup %1924 }
 0x822   :  { %v1327_v25 = vpop.permute.xlu0 %1326  ;;  %v1927_v28 = vpop.eup %1926  ;;  %1930 = vrcp.f32 %v1121_v24  ;;  %v1138_v33 = vmul.f32 %v1925_v27, %v2333_v35 }
 0x823   :  { %1347 = vmatpush.msra.mxu0 %v1327_v25  ;;  %v1137_v12 = vmul.f32 %v1927_v28, %v2342_v59  ;;  %v1929_v34 = vpop.eup %1928 }
 0x824   :  { %1787 = vmatmul.msk.f32.vlgmr.msra.gmra.mxu0 %vm79_vm1, %v1143_v47  ;;  %v1142_v37 = vmul.f32 %v1929_v34, %v2337_v48  ;;  %v2415_v47 = vld [vmem:[%s2543_s4 + $0x3] ss:$0 sm:$0xff] }
 0x828   :  { %v1931_v36 = vpop.eup %1930 }
 0x829   :  { %v1301_v26 = vpop.permute.xlu2 %1300  ;;  %v1141_v35 = vmul.f32 %v1931_v36, %v2350_v18 }
 0x831   :  { %v1145_v29 = vpop.permute.xlu2 %1144  ;;  %v1840_v30 = vpop.permute.xlu1 %1839 }
 0x832   :  { %v1842_v31 = vunpack.i.h.bf16 %v1840_v30  ;;  %v1841_v32 = vunpack.i.l.bf16 %v1840_v30  ;;  %1165 = vmatpush.msrb.mxu1 %v1145_v29 }
 0x834   :  { %1191 = vmatpush.msra.mxu2 %v1841_v32  ;;  %1217 = vmatpush.msra.mxu3 %v1842_v31  ;;  %v1500_v31 = vld [vmem:[%s2541_s2 + $0x58] sm:$0xff]  ;;  %v1499_v32 = vld [vmem:[%s2541_s2 + $0x40] sm:$0xff] }
 0x835   :  { %1781 = vmatmul.msk.f32.vlgmr.msra.gmra.mxu2 %vm79_vm1, %v1137_v12  ;;  %1782 = vmatmul.msk.f32.vlgmr.msra.gmra.mxu3 %vm79_vm1, %v1138_v33  ;;  %v1498_v33 = vld [vmem:[%s2541_s2 + $0x28] sm:$0xff]  ;;  %v1497_v12 = vld [vmem:[%s2541_s2 + $0x10] sm:$0xff] }
 0x836   :  { %1295 = vmatpush.msrb.mxu2 %v1847_v13  ;;  %1321 = vmatpush.msrb.mxu3 %v1301_v26 }
 0x838   :  { %1523 = vmatpush.msra.mxu2 %v1500_v31 }
 0x839   :  { %v1249_v8 = vpop.permute.xlu2 %1248 }
 0x83a   :  { %1269 = vmatpush.msra.mxu1 %v1249_v8  ;;  %1524 = vmatpush.msra.mxu2 %v1499_v32  ;;  %v1551_v8 = vld [vmem:[%s2542_s3 + $0x78] sm:$0xff] }
 0x83b   :  { %1553 = vmatpush.msra.mxu3 %v1551_v8 }
 0x83c   :  { %1525 = vmatpush.msra.mxu2 %v1498_v33 }
 0x83d   :  { %1785 = vmatmul.msk.f32.vlgmr.msrb.gmra.mxu2 %vm79_vm1, %v1141_v35  ;;  %1786 = vmatmul.msk.f32.vlgmr.msrb.gmra.mxu3 %vm79_vm1, %v1142_v37  ;;  %v1550_v37 = vld [vmem:[%s2542_s3 + $0x70] sm:$0xff]  ;;  %v1549_v35 = vld [vmem:[%s2542_s3 + $0x68] sm:$0xff] }
 0x83e   :  { %1526 = vmatpush.msra.mxu2 %v1497_v12  ;;  %1554 = vmatpush.msra.mxu3 %v1550_v37 }
 0x840   :  { %1555 = vmatpush.msra.mxu3 %v1549_v35 }
 0x841   :  { %v1850_v49 = vpop.permute.xlu2 %1849 }
 0x842   :  { %v1852_v53 = vunpack.i.h.bf16 %v1850_v49  ;;  %v1851_v55 = vunpack.i.l.bf16 %v1850_v49  ;;  %v1544_v49 = vld [vmem:[%s2542_s3 + $0x40] sm:$0xff] }
 0x849   :  { %v1855_v57 = vpop.permute.xlu2 %1854 }
 0x84a   :  { %v1857_v59 = vunpack.i.h.bf16 %v1855_v57  ;;  %v1856_v60 = vunpack.i.l.bf16 %v1855_v57 }
 0x84d   :  { %v1118_v10 = vpop.xlane.xlu0 %1117 }
 0x85c   :  { %v1106_v38 = vpop.xlane.xlu1 %1105 }
 0x85d   :  { %1932 = vrcp.f32 %v1106_v38 }
 0x85e   :  { %1934 = vrcp.f32 %v1118_v10 }
 0x863   :  { %v1933_v39 = vpop.eup %1932 }
 0x864   :  { %v1136_v14 = vmul.f32 %v1933_v39, %v1919_v52  ;;  %v1935_v40 = vpop.eup %1934  ;;  %v1548_v39 = vld [vmem:[%s2542_s3 + $0x60] sm:$0xff] }
 0x865   :  { %v1140_v42 = vmul.f32 %v1935_v40, %v2364_v1  ;;  %1556 = vmatpush.msra.mxu3 %v1548_v39 }
 0x866   :  { %1780 = vmatmul.msk.f32.vlgmr.msrb.gmra.mxu1 %vm79_vm1, %v1136_v14 }
 0x867   :  { %1426 = vmatpush.msrb.mxu1 %v1851_v55 }
 0x869   :  { %1427 = vmatpush.msrb.mxu1 %v1852_v53 }
 0x86b   :  { %1428 = vmatpush.msrb.mxu1 %v1856_v60  ;;  %v1542_v60 = vld [vmem:[%s2542_s3 + $0x30] sm:$0xff] }
 0x86d   :  { %1429 = vmatpush.msrb.mxu1 %v1857_v59 }
 0x86e   :  { %1784 = vmatmul.msk.f32.vlgmr.msra.gmra.mxu1 %vm79_vm1, %v1140_v42  ;;  %v1547_v42 = vld [vmem:[%s2542_s3 + $0x58] sm:$0xff] }
 0x86f   :  { %1557 = vmatpush.msra.mxu3 %v1547_v42 }
 0x898   :  { %v1245_v43 = vpop.f32.mrf.mxu0 }
 0x899   :  { %1361 = vrot.lane.b32.xlu0 %v1245_v43, %s1977_s13 }
 0x8a1   :  { %v1349_v56 = vpop.f32.mrf.mxu0  ;;  %1405 = vrot.lane.b32.xlu0 %v1862_v63, %s1975_s11 }
 0x8b8   :  { %v1193_v45 = vpop.f32.mrf.mxu2  ;;  %v1219_v4 = vpop.f32.mrf.mxu3 }
 0x8b9   :  { %1353 = vrot.lane.b32.xlu2 %v1193_v45, %s1976_s12  ;;  %1357 = vrot.lane.b32.xlu1 %v1219_v4, %s1978_s14  ;;  %v1546_v45 = vld [vmem:[%s2542_s3 + $0x50] sm:$0xff] }
 0x8ba   :  { %1558 = vmatpush.msra.mxu3 %v1546_v45 }
 0x8c0   :  { %v1297_v48 = vpop.f32.mrf.mxu2  ;;  %v1323_v5 = vpop.f32.mrf.mxu3 }
 0x8c1   :  { %1368 = vrot.lane.b32.xlu2 %v1297_v48, %s1976_s12  ;;  %v1545_v48 = vld [vmem:[%s2542_s3 + $0x48] sm:$0xff] }
 0x8c2   :  { %1559 = vmatpush.msra.mxu3 %v1545_v48 }
 0x8c4   :  { %1560 = vmatpush.msra.mxu3 %v1544_v49 }
 0x8c9   :  { %1372 = vrot.lane.b32.xlu2 %v1323_v5, %s1978_s14 }
 0x8d1   :  { %1376 = vrot.lane.b32.xlu2 %v1349_v56, %s1977_s13  ;;  %v1543_v56 = vld [vmem:[%s2542_s3 + $0x38] sm:$0xff] }
 0x8d2   :  { %1561 = vmatpush.msra.mxu3 %v1543_v56 }
 0x8d4   :  { %1562 = vmatpush.msra.mxu3 %v1542_v60 }
 0x8e3   :  { %v1167_v15 = vpop.f32.mrf.mxu1 }
 0x8eb   :  { %v1271_v0 = vpop.f32.mrf.mxu1 }
 0x90b   :  { %v1362_v19 = vpop.permute.xlu0 %1361 }
 0x913   :  { %v1354_v62 = vpop.permute.xlu2 %1353  ;;  %v1406_v52 = vpop.permute.xlu0 %1405 }
 0x914   :  { %v1364_v17 = vsel %vm79_vm1, %v1167_v15, %v1354_v62 }
 0x91b   :  { %v1369_v6 = vpop.permute.xlu2 %1368 }
 0x91c   :  { %v1379_v61 = vsel %vm79_vm1, %v1271_v0, %v1369_v6 }
 0x923   :  { %v1373_v16 = vpop.permute.xlu2 %1372 }
 0x924   :  { %v1380_v50 = vsel %vm603_vm2, %v1379_v61, %v1373_v16  ;;  %v1864_v16 = vld [vmem:[%s2543_s4 + $0x4] ss:$0 sm:$0xff] }
 0x92b   :  { %v1358_v18 = vpop.permute.xlu1 %1357  ;;  %v1377_v1 = vpop.permute.xlu2 %1376 }
 0x92c   :  { %v1365_v20 = vsel %vm603_vm2, %v1364_v17, %v1358_v18  ;;  %v1381_v51 = vsel %vm605_vm3, %v1380_v50, %v1377_v1  ;;  %v1541_v17 = vld [vmem:[%s2542_s3 + $0x28] sm:$0xff]  ;;  %v1539_v1 = vld [vmem:[%s2542_s3 + $0x18] sm:$0xff] }
 0x92d   :  { %v1366_v21 = vsel %vm605_vm3, %v1365_v20, %v1362_v19  ;;  %v1540_v20 = vld [vmem:[%s2542_s3 + $0x20] sm:$0xff]  ;;  %1563 = vmatpush.msra.mxu3 %v1541_v17 }
 0x92e   :  { %1788 = vmatmul.msk.f32.vlgmr.msrb.gmra.mxu1 %vm33_vm0, %v1366_v21 }
 0x92f   :  { %1564 = vmatpush.msra.mxu3 %v1540_v20 }
 0x931   :  { %1565 = vmatpush.msra.mxu3 %v1539_v1 }
 0x936   :  { %1789 = vmatmul.msk.f32.gmra.mxu1 %vm33_vm0, %v1381_v51 }
 0x9ab   :  { %v1431_v44 = vpop.f32.mrf.mxu1 }
 0x9ac   :  { %v1432_v58 = vadd.f32 %v1431_v44, %v1406_v52 }
 0x9ae   :  { %v1437_v46 = vadd.f32 %v1432_v58, %v2257_v11  ;;  %v1538_v58 = vld [vmem:[%s2542_s3 + $0x10] sm:$0xff] }
 0x9af   :  { %1566 = vmatpush.msra.mxu3 %v1538_v58 }
 0x9b0   :  { %v1441_v7 = vsel %vm33_vm0, %v1437_v46, 0.0 }
 0x9b1   :  { %1442 = vadd.xlane.f32.xlu1 %v1441_v7  ;;  %v1536_v7 = vld [vmem:[%s2542_s3] sm:$0xff] }
 0x9b3   :  { %v1434_v2 = vpop.f32.mrf.mxu1 }
 0x9b4   :  { %v1435_v3 = vadd.f32 %v1434_v2, %v1406_v52  ;;  %v1865_v2 = vld [vmem:[%s2543_s4 + $0x2] ss:$0 sm:$0xff] }
 0x9b6   :  { %v1438_v22 = vadd.f32 %v1435_v3, %v2261_v41 }
 0x9b8   :  { %v1444_v23 = vsel %vm33_vm0, %v1438_v22, 0.0 }
 0x9b9   :  { %1445 = vadd.xlane.f32.xlu2 %v1444_v23 }
 0x9d1   :  { %1487 = vrot.lane.b32.xlu2 %v2415_v47, %s1975_s11 }
 0xa24   :  { %v1443_v24 = vpop.xlane.xlu1 %1442 }
 0xa25   :  { %v1447_v11 = vmul.f32 %v1443_v24, %v2225_v54 }
 0xa27   :  { %v1449_v25 = vsub.f32 %v1437_v46, %v1447_v11  ;;  %v1537_v46 = vld [vmem:[%s2542_s3 + $0x8] sm:$0xff]  ;;  %s1980_s3 = smov [#allocation2]  }
 0xa28   :  { %1567 = vmatpush.msra.mxu3 %v1537_v46  ;;  %s1721_s4 = sshll.u32 %s1980_s3, 4  ;;  %s1722_s4 = int_to_ptr.vmem [resolvable:$true] %s1721_s4 }
 0xa29   :  { %v1451_v9 = vmul.f32 %v1449_v25, %v1449_v25 }
 0xa2a   :  { %1568 = vmatpush.msra.mxu3 %v1536_v7 }
 0xa2b   :  { %v1453_v26 = vsel %vm33_vm0, %v1451_v9, 0.0 }
 0xa2c   :  { %1454 = vadd.xlane.f32.xlu0 %v1453_v26  ;;  %v1446_v41 = vpop.xlane.xlu2 %1445 }
 0xa2d   :  { %v1448_v27 = vmul.f32 %v1446_v41, %v2225_v54 }
 0xa2f   :  { %v2422_v28 = vsub.f32 %v1438_v22, %v1448_v27 }
 0xa31   :  { %v1452_v29 = vmul.f32 %v2422_v28, %v2422_v28 }
 0xa33   :  { %v1456_v30 = vsel %vm33_vm0, %v1452_v29, 0.0 }
 0xa34   :  { %1457 = vadd.xlane.f32.xlu1 %v1456_v30  ;;  %v1488_v6 = vpop.permute.xlu2 %1487 }
 0xa9f   :  { %v1455_v13 = vpop.xlane.xlu0 %1454 }
 0xaa0   :  { %v1459_v34 = vmul.f32 %v1455_v13, %v2225_v54 }
 0xaa2   :  { %v1461_v36 = vadd.f32 1e-05, %v1459_v34 }
 0xaa4   :  { %1936 = vrsqrt.f32 %v1461_v36  ;;  %vm1469_vm12 = vweird.f32 %v1461_v36 }
 0xaa7   :  { %v1458_v38 = vpop.xlane.xlu1 %1457 }
 0xaa8   :  { %v1460_v10 = vmul.f32 %v1458_v38, %v2225_v54 }
 0xaaa   :  { %v1937_v14 = vpop.eup %1936  ;;  %v1462_v40 = vadd.f32 1e-05, %v1460_v10 }
 0xaab   :  { %v1464_v43 = vmul.f32 %v1937_v14, %v1461_v36  ;;  %vm1470_vm11 = vweird.f32 %v1937_v14 }
 0xaac   :  { %1938 = vrsqrt.f32 %v1462_v40  ;;  %vm1471_vm13 = vmor %vm1469_vm12, %vm1470_vm11  ;;  %vm1479_vm15 = vweird.f32 %v1462_v40  ;;  %vm1712_vm11 = vcmask 1041408  }
 0xaad   :  { %v1465_v4 = vmul.f32 %v1937_v14, %v1464_v43 }
 0xaaf   :  { %v1466_v5 = vmul.f32 0.5, %v1465_v4 }
 0xab1   :  { %v1467_v53 = vsub.f32 1.5, %v1466_v5 }
 0xab2   :  { %v1939_v55 = vpop.eup %1938 }
 0xab3   :  { %v1474_v57 = vmul.f32 %v1939_v55, %v1462_v40  ;;  %v1468_v59 = vmul.f32 %v1937_v14, %v1467_v53  ;;  %vm1480_vm14 = vweird.f32 %v1939_v55 }
 0xab4   :  { %vm1481_vm1 = vmor %vm1479_vm15, %vm1480_vm14 }
 0xab5   :  { %v1475_v62 = vmul.f32 %v1939_v55, %v1474_v57  ;;  %v1472_v63 = vsel %vm1471_vm13, %v1937_v14, %v1468_v59 }
 0xab6   :  { %v1483_v15 = vmul.f32 %v1472_v63, %v1449_v25 }
 0xab7   :  { %v1476_v18 = vmul.f32 0.5, %v1475_v62 }
 0xab8   :  { %v1490_v19 = vmul.f32 %v1488_v6, %v1483_v15 }
 0xab9   :  { %v1477_v21 = vsub.f32 1.5, %v1476_v18 }
 0xaba   :  { %v1495_v0 = vadd.f32 %v1864_v16, %v1490_v19 }
 0xabb   :  { %v1478_v61 = vmul.f32 %v1939_v55, %v1477_v21 }
 0xabc   :  { %1790 = vmatmul.msk.f32.vlgmr.msra.gmra.mxu2 %vm33_vm0, %v1495_v0 }
 0xabd   :  { %v1482_v50 = vsel %vm1481_vm1, %v1939_v55, %v1478_v61 }
 0xabe   :  { %v1484_v51 = vmul.f32 %v1482_v50, %v2422_v28 }
 0xac0   :  { %v1491_v52 = vmul.f32 %v1488_v6, %v1484_v51 }
 0xac2   :  { %v1496_v44 = vadd.f32 %v1864_v16, %v1491_v52 }
 0xac4   :  { %1791 = vmatmul.msk.f32.gmra.mxu2 %vm33_vm0, %v1496_v44 }
 0xb3f   :  { %v1528_v3 = vpop.f32.mrf.mxu2 }
 0xb40   :  { %v1529_v22 = vadd.f32 %v1865_v2, %v1528_v3 }
 0xb42   :  { %v1534_v23 = vmax.f32 %v1529_v22, 0.0 }
 0xb44   :  { %1569 = vmatmul.f32.vlgmr.msra.gmra.mxu3 %v1534_v23 }
 0xb47   :  { %v1531_v24 = vpop.f32.mrf.mxu2 }
 0xb48   :  { %v1532_v11 = vadd.f32 %v1865_v2, %v1531_v24 }
 0xb4a   :  { %v1535_v25 = vmax.f32 %v1532_v11, 0.0 }
 0xb4c   :  { %1572 = vmatmul.f32.gmra.mxu3 %v1535_v25 }
 0xbc7   :  { %v1570_v9 = vpop.f32.mrf.mxu3 }
 0xbc8   :  { %v1571_v26 = vadd.f32 %v2415_v47, %v1570_v9 }
 0xbca   :  { %v1576_v41 = vadd.f32 %v1571_v26, %v1495_v0 }
 0xbcc   :  { %v1578_v27 = vsel %vm33_vm0, %v1576_v41, 0.0 }
 0xbcd   :  { %1579 = vadd.xlane.f32.xlu1 %v1578_v27 }
 0xbcf   :  { %v1573_v28 = vpop.f32.mrf.mxu3 }
 0xbd0   :  { %v1574_v29 = vadd.f32 %v2415_v47, %v1573_v28 }
 0xbd2   :  { %v1577_v30 = vadd.f32 %v1574_v29, %v1496_v44 }
 0xbd4   :  { %v1581_v31 = vsel %vm33_vm0, %v1577_v30, 0.0 }
 0xbd5   :  { %1582 = vadd.xlane.f32.xlu0 %v1581_v31 }
 0xc40   :  { %v1580_v32 = vpop.xlane.xlu1 %1579 }
 0xc41   :  { %v1584_v33 = vmul.f32 %v1580_v32, %v2225_v54 }
 0xc43   :  { %v1586_v12 = vsub.f32 %v1576_v41, %v1584_v33 }
 0xc45   :  { %v1588_v13 = vmul.f32 %v1586_v12, %v1586_v12 }
 0xc47   :  { %v1590_v34 = vsel %vm33_vm0, %v1588_v13, 0.0 }
 0xc48   :  { %v1583_v36 = vpop.xlane.xlu0 %1582  ;;  %1591 = vadd.xlane.f32.xlu1 %v1590_v34 }
 0xc49   :  { %v1585_v8 = vmul.f32 %v1583_v36, %v2225_v54 }
 0xc4b   :  { %v1587_v37 = vsub.f32 %v1577_v30, %v1585_v8 }
 0xc4d   :  { %v1589_v35 = vmul.f32 %v1587_v37, %v1587_v37 }
 0xc4f   :  { %v1593_v38 = vsel %vm33_vm0, %v1589_v35, 0.0 }
 0xc50   :  { %1594 = vadd.xlane.f32.xlu0 %v1593_v38 }
 0xc61   :  { %1627 = vrot.lane.b32.xlu1 %v1864_v16, %s1974_s10 }
 0xc64   :  { %1622 = vrot.lane.b32.xlu0 %v1864_v16, %s1973_s9 }
 0xcbb   :  { %v1592_v47 = vpop.xlane.xlu1 %1591 }
 0xcbc   :  { %v1596_v10 = vmul.f32 %v1592_v47, %v2225_v54 }
 0xcbe   :  { %v1598_v39 = vadd.f32 1e-05, %v1596_v10 }
 0xcc0   :  { %1940 = vrsqrt.f32 %v1598_v39  ;;  %vm1606_vm3 = vweird.f32 %v1598_v39 }
 0xcc3   :  { %v1595_v14 = vpop.xlane.xlu0 %1594 }
 0xcc4   :  { %v1597_v40 = vmul.f32 %v1595_v14, %v2225_v54 }
 0xcc6   :  { %v1941_v42 = vpop.eup %1940  ;;  %v1599_v43 = vadd.f32 1e-05, %v1597_v40 }
 0xcc7   :  { %v1601_v45 = vmul.f32 %v1941_v42, %v1598_v39  ;;  %vm1607_vm2 = vweird.f32 %v1941_v42 }
 0xcc8   :  { %1942 = vrsqrt.f32 %v1599_v43  ;;  %vm1608_vm4 = vmor %vm1606_vm3, %vm1607_vm2  ;;  %vm1616_vm6 = vweird.f32 %v1599_v43 }
 0xcc9   :  { %v1602_v4 = vmul.f32 %v1941_v42, %v1601_v45 }
 0xccb   :  { %v1603_v48 = vmul.f32 0.5, %v1602_v4 }
 0xccd   :  { %v1604_v5 = vsub.f32 1.5, %v1603_v48 }
 0xcce   :  { %v1943_v49 = vpop.eup %1942 }
 0xccf   :  { %v1611_v53 = vmul.f32 %v1943_v49, %v1599_v43  ;;  %v1605_v55 = vmul.f32 %v1941_v42, %v1604_v5  ;;  %vm1617_vm5 = vweird.f32 %v1943_v49 }
 0xcd0   :  { %vm1618_vm7 = vmor %vm1616_vm6, %vm1617_vm5 }
 0xcd1   :  { %v1612_v56 = vmul.f32 %v1943_v49, %v1611_v53  ;;  %v1609_v57 = vsel %vm1608_vm4, %v1941_v42, %v1605_v55 }
 0xcd2   :  { %v1620_v62 = vmul.f32 %v1609_v57, %v1586_v12 }
 0xcd3   :  { %v1613_v59 = vmul.f32 0.5, %v1612_v56  ;;  %v1628_v63 = vpop.permute.xlu1 %1627 }
 0xcd5   :  { %v1614_v60 = vsub.f32 1.5, %v1613_v59 }
 0xcd6   :  { %v1623_v54 = vpop.permute.xlu0 %1622 }
 0xcd7   :  { %v1615_v6 = vmul.f32 %v1943_v49, %v1614_v60  ;;  %v1625_v15 = vmul.f32 %v1623_v54, %v1620_v62 }
 0xcd9   :  { %v1619_v16 = vsel %vm1618_vm7, %v1943_v49, %v1615_v6  ;;  %v1630_v17 = vadd.f32 %v1628_v63, %v1625_v15 }
 0xcda   :  { %v1621_v18 = vmul.f32 %v1619_v16, %v1587_v37 }
 0xcdb   :  { %v1647_v19 = vrot.slane %v1630_v17, 5  ;;  %v1633_v20 = vrot.slane %v1630_v17, 1  ;;  %v1651_v61 = vrot.slane %v1630_v17, 6  ;;  %v1655_v52 = vrot.slane %v1630_v17, 7 }
 0xcdc   :  { %v1626_v21 = vmul.f32 %v1623_v54, %v1621_v18  ;;  %v1637_v44 = vrot.slane %v1630_v17, 2  ;;  %v1641_v46 = vrot.slane %v1630_v17, 3  ;;  %v1645_v28 = vrot.slane %v1630_v17, 4 }
 0xcdd   :  { %1648 = vrot.lane.b32.xlu0 %v1647_v19, %s1975_s11  ;;  %1634 = vrot.lane.b32.xlu1 %v1633_v20, %s1975_s11 }
 0xcde   :  { %v1631_v0 = vadd.f32 %v1628_v63, %v1626_v21 }
 0xce0   :  { %v1682_v1 = vrot.slane %v1631_v0, 5  ;;  %v1690_v50 = vrot.slane %v1631_v0, 7  ;;  %v1686_v51 = vrot.slane %v1631_v0, 6  ;;  %v1668_v58 = vrot.slane %v1631_v0, 1 }
 0xce1   :  { %v1672_v7 = vrot.slane %v1631_v0, 2  ;;  %v1676_v2 = vrot.slane %v1631_v0, 3  ;;  %v1680_v41 = vrot.slane %v1631_v0, 4 }
 0xce2   :  { %1683 = vrot.lane.b32.xlu2 %v1682_v1, %s1975_s11 }
 0xce5   :  { %1652 = vrot.lane.b32.xlu0 %v1651_v61, %s1974_s10  ;;  %1691 = vrot.lane.b32.xlu1 %v1690_v50, %s1973_s9 }
 0xcea   :  { %1687 = vrot.lane.b32.xlu2 %v1686_v51, %s1974_s10 }
 0xced   :  { %1656 = vrot.lane.b32.xlu0 %v1655_v52, %s1973_s9  ;;  %1638 = vrot.lane.b32.xlu1 %v1637_v44, %s1974_s10 }
 0xcf2   :  { %1669 = vrot.lane.b32.xlu2 %v1668_v58, %s1975_s11  ;;  %s1723_s11 = sshll.u32 %s2544_s5, 4  ;;  %s1724_s11 = int_to_ptr.hbm [resolvable:$true] %s1723_s11 }
 0xcf5   :  { %1642 = vrot.lane.b32.xlu0 %v1641_v46, %s1973_s9 }
 0xcfa   :  { %1673 = vrot.lane.b32.xlu2 %v1672_v7, %s1974_s10 }
 0xd02   :  { %1677 = vrot.lane.b32.xlu2 %v1676_v2, %s1973_s9 }
 0xd3c   :  { %v1684_v3 = vpop.permute.xlu2 %1683 }
 0xd3d   :  { %v1697_v27 = vsel %vm33_vm0, %v1680_v41, %v1684_v3 }
 0xd44   :  { %v1688_v22 = vpop.permute.xlu2 %1687 }
 0xd45   :  { %v1698_v29 = vsel %vm1660_vm8, %v1697_v27, %v1688_v22 }
 0xd4c   :  { %v1670_v23 = vpop.permute.xlu2 %1669 }
 0xd4d   :  { %v1694_v13 = vsel %vm33_vm0, %v1631_v0, %v1670_v23 }
 0xd4f   :  { %v1649_v24 = vpop.permute.xlu0 %1648  ;;  %v1635_v11 = vpop.permute.xlu1 %1634 }
 0xd50   :  { %v1664_v31 = vsel %vm33_vm0, %v1645_v28, %v1649_v24  ;;  %v1659_v47 = vsel %vm33_vm0, %v1630_v17, %v1635_v11 }
 0xd54   :  { %v1674_v25 = vpop.permute.xlu2 %1673 }
 0xd55   :  { %v1695_v36 = vsel %vm1660_vm8, %v1694_v13, %v1674_v25 }
 0xd57   :  { %v1653_v9 = vpop.permute.xlu0 %1652  ;;  %v1692_v26 = vpop.permute.xlu1 %1691 }
 0xd58   :  { %v1699_v32 = vsel %vm1662_vm9, %v1698_v29, %v1692_v26  ;;  %v1665_v33 = vsel %vm1660_vm8, %v1664_v31, %v1653_v9 }
 0xd59   :  { %v1703_v8 = vrot.slane %v1699_v32, 7 }
 0xd5c   :  { %v1678_v12 = vpop.permute.xlu2 %1677 }
 0xd5d   :  { %v1696_v37 = vsel %vm1662_vm9, %v1695_v36, %v1678_v12 }
 0xd5e   :  { %v1702_v10 = vrot.slane %v1696_v37, 7 }
 0xd5f   :  { %v1657_v30 = vpop.permute.xlu0 %1656  ;;  %v1639_v35 = vpop.permute.xlu1 %1638 }
 0xd60   :  { %v1666_v34 = vsel %vm1662_vm9, %v1665_v33, %v1657_v30  ;;  %v1661_v39 = vsel %vm1660_vm8, %v1659_v47, %v1639_v35 }
 0xd61   :  { %v1708_v38 = vsel %vm1706_vm10, %v1666_v34, %v1703_v8 }
 0xd62   :  { %v1711_v40 = vrot.slane %v1708_v38, 6 }
 0xd67   :  { %v1643_v14 = vpop.permute.xlu0 %1642 }
 0xd68   :  { %v1663_v42 = vsel %vm1662_vm9, %v1661_v39, %v1643_v14 }
 0xd69   :  { %v1707_v43 = vsel %vm1706_vm10, %v1663_v42, %v1702_v10 }
 0xd6a   :  { %v1713_v45 = vsel %vm1712_vm11, %v1707_v43, %v1711_v40 }
 0xd6b   :  { %1715 = vst [vmem:[#allocation2] sm:$0xf] %v1713_v45 }
 0xd6c   :  { %1726 = dma.vmem_to_hbm [thread:$0]  %s1722_s4, 64, %s1724_s11, [#allocation3]  }
 0xd6d   :  { %1968 = dma.done.wait [#allocation3], 64  }
 0xd6e   :  { %1969 = vsyncadd [#allocation3], 4294967232 }
 0xd6f   :  { %1731 = vsyncpa [#allocation3], 1 }

</bundles_post_ra>
